<compile_context>
chip_gen: v7x
topology: tpu7x:2x2x1
jax: 0.10.0
libtpu: 0.0.40
codegen_flags: <defaults>
</compile_context>

<pallas_src>
import math

import jax
import jax.numpy as jnp
from jax.experimental import pallas as pl
from jax.experimental.pallas import tpu as pltpu

# ----- small, module-consistent hyperparameters -----
B = 2              # batch
S = 8              # sequence length
H = 32             # hidden_dim
L = 2              # nlayers (transformer encoder layers)
NH = 4             # attention heads (must divide H)
DH = H // NH       # head dim
FF = 4 * H         # Bert intermediate size (hidden_expand=4)
AA_VOCAB = 27      # AA embedding vocabulary (padding_idx = 0)
MOD_DIM = 103      # modification feature size
MOD_EMB = 8        # AA_Mod_Embedding mod width (first 6 passthrough + Linear(MOD_DIM-6 -> 2))
LN_EPS = 1e-12     # HF Bert layer_norm_eps

G = B              # one sequence per grid program -> >= 2 programs feeds both v7x TensorCores


def _layer_norm(x, g, b):
    m = jnp.mean(x, axis=-1, keepdims=True)
    v = jnp.mean(jnp.square(x - m), axis=-1, keepdims=True)
    return (x - m) * jax.lax.rsqrt(v + LN_EPS) * g + b


def _softmax_last(x):
    m = jnp.max(x, axis=-1, keepdims=True)
    e = jnp.exp(x - m)
    return e * pl.reciprocal(jnp.sum(e, axis=-1, keepdims=True), approx=True)


def model_kernel(aa_ref, mod_ref,
                 pe_ref, aa_table_ref, mod_lin_ref,
                 wqkv_ref, bqkv_ref, wo_ref, bo_ref, ln1g_ref, ln1b_ref,
                 wi_ref, bi_ref, wf_ref, bff_ref, ln2g_ref, ln2b_ref,
                 w_pool_ref, w_out_ref, prelu_ref, b_out_ref,
                 out_ref):
    f32 = jnp.float32
    bf16 = jnp.bfloat16

    # ---- AA_Mod_Embedding fused in-kernel ------------------------------------------------
    aa_idx = aa_ref[0]                                            # (S, 1) int32
    lane = jax.lax.broadcasted_iota(jnp.int32, (S, AA_VOCAB), 1)
    onehot = (aa_idx == lane).astype(bf16)                        # (S, AA_VOCAB)
    aa_emb = jnp.dot(onehot, aa_table_ref[...],
                     preferred_element_type=f32)                  # (S, H - MOD_EMB); row 0 is zero (padding_idx)

    mod = mod_ref[0]                                              # (S, MOD_DIM) f32
    mod_proj = jnp.dot(mod[:, 6:].astype(bf16), mod_lin_ref[...],
                       preferred_element_type=f32)                # (S, MOD_EMB - 6)
    x0 = jnp.concatenate([aa_emb, mod[:, :6], mod_proj], axis=-1)  # (S, H)

    x = x0 + pe_ref[...]                                          # positional encoding

    # ---- nlayers of HF-Bert style post-LN transformer -------------------------------------
    for l in range(L):
        # fused QKV projection (one MXU op instead of three)
        qkv = jnp.dot(x.astype(bf16), wqkv_ref[l],
                      preferred_element_type=f32) + bqkv_ref[l]   # (S, 3H)
        qkv_b = qkv.astype(bf16)
        ctx_heads = []
        for h in range(NH):
            lo, hi = h * DH, (h + 1) * DH
            qh = qkv_b[:, lo:hi]                  # 1/sqrt(DH) folded into Wq at build time
            kh = qkv_b[:, H + lo:H + hi]
            vh = qkv_b[:, 2 * H + lo:2 * H + hi]
            scores = jax.lax.dot_general(qh, kh, (((1,), (1,)), ((), ())),
                                         preferred_element_type=f32)      # (S, S)
            probs = _softmax_last(scores)
            # per-head context stays in registers (no VMEM scratch round trip)
            ctx_heads.append(jnp.dot(probs.astype(bf16), vh,
                                     preferred_element_type=f32))          # (S, DH)
        attn_in = jnp.concatenate(ctx_heads, axis=-1)             # (S, H) concat heads in vregs
        attn_out = jnp.dot(attn_in.astype(bf16), wo_ref[l],
                           preferred_element_type=f32) + bo_ref[l]
        x = _layer_norm(x + attn_out, ln1g_ref[l], ln1b_ref[l])

        # ---- Bert feed-forward ----
        inter = jnp.dot(x.astype(bf16), wi_ref[l], preferred_element_type=f32) + bi_ref[l]
        # TODO(synk): HF Bert "gelu" is erf-based; tanh-approx GELU used for guaranteed TPU lowering.
        inter = jax.nn.gelu(inter, approximate=True)
        ff = jnp.dot(inter.astype(bf16), wf_ref[l], preferred_element_type=f32) + bff_ref[l]
        x = _layer_norm(x + ff, ln2g_ref[l], ln2b_ref[l])

    # ---- residual mix + SeqAttentionSum -> PReLU -> Linear(H,1) -> sigmoid ------------------
    y = x + 0.2 * x0                                              # (S, H), dropout = identity
    logits = jnp.sum(y * w_pool_ref[...], axis=-1, keepdims=True)  # (S, 1)  (N=1 matmul -> VPU reduce)
    lmax = jnp.max(logits, axis=0, keepdims=True)
    e = jnp.exp(logits - lmax)
    attn_w = e * pl.reciprocal(jnp.sum(e, axis=0, keepdims=True), approx=True)
    pooled = jnp.sum(y * attn_w, axis=0, keepdims=True)           # (1, H)
    alpha = prelu_ref[0, 0]                                       # SMEM scalar
    pooled = jnp.where(pooled >= 0, pooled, alpha * pooled)       # PReLU (shared alpha)
    o = jnp.sum(pooled * w_out_ref[...], axis=-1, keepdims=True) + b_out_ref[0, 0]
    out_ref[...] = jax.nn.sigmoid(o).reshape(1, 1, 1)


def build_params(key):
    keys = jax.random.split(key, 10)
    it = iter(keys)

    def nrm(shape, scale=0.02, dtype=jnp.float32):
        return (scale * jax.random.normal(next(it), shape)).astype(dtype)

    bf16 = jnp.bfloat16

    aa_table = nrm((AA_VOCAB, H - MOD_EMB)).at[0].set(0.0).astype(bf16)   # padding_idx = 0
    mod_lin = nrm((MOD_DIM - 6, MOD_EMB - 6), dtype=bf16)                 # Linear(97 -> 2, bias=False)

    # sin/cos positional encoding, (S, H)
    pos = jnp.arange(S, dtype=jnp.float32)[:, None]
    div = jnp.exp(jnp.arange(0, H, 2, dtype=jnp.float32) * (-math.log(10000.0) / H))
    pe = jnp.zeros((S, H), jnp.float32)
    pe = pe.at[:, 0::2].set(jnp.sin(pos * div))
    pe = pe.at[:, 1::2].set(jnp.cos(pos * div))

    zeros = lambda shp: jnp.zeros(shp, jnp.float32)
    ones = lambda shp: jnp.ones(shp, jnp.float32)

    # fused QKV weight (bf16); the 1/sqrt(DH) attention scale is folded into the Q block
    wq = nrm((L, H, H)) / math.sqrt(DH)
    wk = nrm((L, H, H))
    wv = nrm((L, H, H))
    wqkv = jnp.concatenate([wq, wk, wv], axis=-1).astype(bf16)            # (L, H, 3H)

    return dict(
        pe=pe, aa_table=aa_table, mod_lin=mod_lin,
        wqkv=wqkv, bqkv=zeros((L, 1, 3 * H)),
        wo=nrm((L, H, H), dtype=bf16), bo=zeros((L, 1, H)),
        ln1g=ones((L, 1, H)), ln1b=zeros((L, 1, H)),
        wi=nrm((L, H, FF), dtype=bf16), bi=zeros((L, 1, FF)),
        wf=nrm((L, FF, H), dtype=bf16), bff=zeros((L, 1, H)),
        ln2g=ones((L, 1, H)), ln2b=zeros((L, 1, H)),
        w_pool=nrm((1, H)),
        w_out=nrm((1, H)),
        prelu=jnp.full((1, 1), 0.25, jnp.float32),
        b_out=zeros((1, 1)),
    )


VMEM_WEIGHTS = ["pe", "aa_table", "mod_lin", "wqkv", "bqkv", "wo", "bo", "ln1g", "ln1b",
                "wi", "bi", "wf", "bff", "ln2g", "ln2b", "w_pool", "w_out"]
SMEM_WEIGHTS = ["prelu", "b_out"]


@jax.jit
def forward(aa_indices, mod_x, params):
    # Only layout plumbing in the wrapper; the embedding itself is fused into the kernel.
    aa3 = aa_indices.astype(jnp.int32).reshape(B, S, 1)
    mod_x = mod_x.astype(jnp.float32)

    vmem_w = [params[k] for k in VMEM_WEIGHTS]
    smem_w = [params[k] for k in SMEM_WEIGHTS]

    def full_spec(a):
        n = a.ndim
        return pl.BlockSpec(a.shape, lambda g, n=n: (0,) * n)

    smem_spec = pl.BlockSpec(memory_space=pltpu.MemorySpace.SMEM)

    in_specs = ([pl.BlockSpec((1, S, 1), lambda g: (g, 0, 0)),           # aa_indices (int32, VMEM)
                 pl.BlockSpec((1, S, MOD_DIM), lambda g: (g, 0, 0))]     # mod features
                + [full_spec(w) for w in vmem_w]
                + [smem_spec for _ in smem_w])

    flops = int(G * (2 * S * AA_VOCAB * (H - MOD_EMB)
                     + 2 * S * (MOD_DIM - 6) * (MOD_EMB - 6)
                     + L * (2 * S * H * 3 * H + 4 * NH * S * S * DH
                            + 2 * S * H * H + 4 * S * H * FF)
                     + 4 * S * H))
    transc = int(G * (L * (NH * S * S + S * FF) + S + 1))
    bytes_acc = int(aa3.size * 4 + mod_x.size * 4 + B * 4
                    + sum(w.size * w.dtype.itemsize for w in vmem_w + smem_w))

    out = pl.pallas_call(
        model_kernel,
        out_shape=jax.ShapeDtypeStruct((G, 1, 1), jnp.float32),
        grid=(G,),
        in_specs=in_specs,
        out_specs=pl.BlockSpec((1, 1, 1), lambda g: (g, 0, 0)),
        compiler_params=pltpu.CompilerParams(dimension_semantics=("parallel",)),
        cost_estimate=pl.CostEstimate(flops=flops, transcendentals=transc,
                                      bytes_accessed=bytes_acc),
    )(aa3, mod_x, *vmem_w, *smem_w)
    return out.reshape(B)          # matches torch .squeeze(1) on (B, 1), post-sigmoid


if __name__ == "__main__":
    key = jax.random.PRNGKey(0)
    kp, ka, km = jax.random.split(key, 3)
    params = build_params(kp)
    aa_indices = jax.random.randint(ka, (B, S), 1, AA_VOCAB)            # 0 reserved for padding
    mod_x = 0.1 * jax.random.normal(km, (B, S, MOD_DIM), dtype=jnp.float32)

    out = forward(aa_indices, mod_x, params)
    jax.block_until_ready(out)
    assert out.shape == (B,)
    assert bool(jnp.all((out >= 0.0) & (out <= 1.0)))
    print("KERNEL_OK")
</pallas_src>

<mosaic_0001>
module attributes {stable_mosaic.version = 11 : i64} {
  func.func @model_kernel(%arg0: i32, %arg1: memref<1x8x1xi32, #tpu.memory_space<vmem>>, %arg2: memref<1x8x103xf32, #tpu.memory_space<vmem>>, %arg3: memref<8x32xf32, #tpu.memory_space<vmem>>, %arg4: memref<27x24xbf16, #tpu.memory_space<vmem>>, %arg5: memref<97x2xbf16, #tpu.memory_space<vmem>>, %arg6: memref<2x32x96xbf16, #tpu.memory_space<vmem>>, %arg7: memref<2x1x96xf32, #tpu.memory_space<vmem>>, %arg8: memref<2x32x32xbf16, #tpu.memory_space<vmem>>, %arg9: memref<2x1x32xf32, #tpu.memory_space<vmem>>, %arg10: memref<2x1x32xf32, #tpu.memory_space<vmem>>, %arg11: memref<2x1x32xf32, #tpu.memory_space<vmem>>, %arg12: memref<2x32x128xbf16, #tpu.memory_space<vmem>>, %arg13: memref<2x1x128xf32, #tpu.memory_space<vmem>>, %arg14: memref<2x128x32xbf16, #tpu.memory_space<vmem>>, %arg15: memref<2x1x32xf32, #tpu.memory_space<vmem>>, %arg16: memref<2x1x32xf32, #tpu.memory_space<vmem>>, %arg17: memref<2x1x32xf32, #tpu.memory_space<vmem>>, %arg18: memref<1x32xf32, #tpu.memory_space<vmem>>, %arg19: memref<1x32xf32, #tpu.memory_space<vmem>>, %arg20: memref<1x1xf32, #tpu.memory_space<smem>>, %arg21: memref<1x1xf32, #tpu.memory_space<smem>>, %arg22: memref<1x1x1xf32, #tpu.memory_space<vmem>>) attributes {dimension_semantics = [#tpu.dimension_semantics<parallel>], iteration_bounds = array<i64: 2>, scalar_prefetch = 0 : i64, scratch_operands = 0 : i64, tpu.core_type = #tpu.core_type<tc>, window_params = [{transform_indices = @transform_0, window_bounds = array<i64: 1, 8, 1>}, {transform_indices = @transform_1, window_bounds = array<i64: 1, 8, 103>}, {pipeline_mode = #tpu.pipeline_mode<synchronous>, transform_indices = @transform_2, window_bounds = array<i64: 8, 32>}, {pipeline_mode = #tpu.pipeline_mode<synchronous>, transform_indices = @transform_3, window_bounds = array<i64: 27, 24>}, {pipeline_mode = #tpu.pipeline_mode<synchronous>, transform_indices = @transform_4, window_bounds = array<i64: 97, 2>}, {pipeline_mode = #tpu.pipeline_mode<synchronous>, transform_indices = @transform_5, window_bounds = array<i64: 2, 32, 96>}, {pipeline_mode = #tpu.pipeline_mode<synchronous>, transform_indices = @transform_6, window_bounds = array<i64: 2, 1, 96>}, {pipeline_mode = #tpu.pipeline_mode<synchronous>, transform_indices = @transform_7, window_bounds = array<i64: 2, 32, 32>}, {pipeline_mode = #tpu.pipeline_mode<synchronous>, transform_indices = @transform_8, window_bounds = array<i64: 2, 1, 32>}, {pipeline_mode = #tpu.pipeline_mode<synchronous>, transform_indices = @transform_9, window_bounds = array<i64: 2, 1, 32>}, {pipeline_mode = #tpu.pipeline_mode<synchronous>, transform_indices = @transform_10, window_bounds = array<i64: 2, 1, 32>}, {pipeline_mode = #tpu.pipeline_mode<synchronous>, transform_indices = @transform_11, window_bounds = array<i64: 2, 32, 128>}, {pipeline_mode = #tpu.pipeline_mode<synchronous>, transform_indices = @transform_12, window_bounds = array<i64: 2, 1, 128>}, {pipeline_mode = #tpu.pipeline_mode<synchronous>, transform_indices = @transform_13, window_bounds = array<i64: 2, 128, 32>}, {pipeline_mode = #tpu.pipeline_mode<synchronous>, transform_indices = @transform_14, window_bounds = array<i64: 2, 1, 32>}, {pipeline_mode = #tpu.pipeline_mode<synchronous>, transform_indices = @transform_15, window_bounds = array<i64: 2, 1, 32>}, {pipeline_mode = #tpu.pipeline_mode<synchronous>, transform_indices = @transform_16, window_bounds = array<i64: 2, 1, 32>}, {pipeline_mode = #tpu.pipeline_mode<synchronous>, transform_indices = @transform_17, window_bounds = array<i64: 1, 32>}, {pipeline_mode = #tpu.pipeline_mode<synchronous>, transform_indices = @transform_18, window_bounds = array<i64: 1, 32>}, {transform_indices = @transform_19, window_bounds = array<i64: 1, 1>}, {transform_indices = @transform_20, window_bounds = array<i64: 1, 1>}, {transform_indices = @transform_21, window_bounds = array<i64: 1, 1, 1>}]} {
    %c0 = arith.constant 0 : index
    %c0_0 = arith.constant 0 : index
    %c0_1 = arith.constant 0 : index
    %0 = vector.load %arg1[%c0, %c0_0, %c0_1] : memref<1x8x1xi32, #tpu.memory_space<vmem>>, vector<1x8x1xi32>
    %1 = vector.shape_cast %0 : vector<1x8x1xi32> to vector<8x1xi32>
    %2 = tpu.iota {dimensions = array<i32: 1>} : vector<8x27xi32>
    %3 = vector.broadcast %1 : vector<8x1xi32> to vector<8x27xi32>
    %4 = arith.cmpi eq, %3, %2 : vector<8x27xi32>
    %5 = arith.extui %4 : vector<8x27xi1> to vector<8x27xi32>
    %6 = arith.sitofp %5 : vector<8x27xi32> to vector<8x27xf32>
    %7 = arith.truncf %6 : vector<8x27xf32> to vector<8x27xbf16>
    %c0_2 = arith.constant 0 : index
    %c0_3 = arith.constant 0 : index
    %8 = vector.load %arg4[%c0_2, %c0_3] : memref<27x24xbf16, #tpu.memory_space<vmem>>, vector<27x24xbf16>
    %cst = arith.constant dense<0.000000e+00> : vector<8x24xf32>
    %9 = tpu.matmul %7, %8, %cst {dimension_numbers = #tpu.dot_dimension_numbers<[1], [0], [0], [1], [0, 0, 1, 1], [], []>} : vector<8x27xbf16>, vector<27x24xbf16>, vector<8x24xf32> -> vector<8x24xf32>
    %c0_4 = arith.constant 0 : index
    %c0_5 = arith.constant 0 : index
    %c0_6 = arith.constant 0 : index
    %10 = vector.load %arg2[%c0_4, %c0_5, %c0_6] : memref<1x8x103xf32, #tpu.memory_space<vmem>>, vector<1x8x103xf32>
    %11 = vector.shape_cast %10 : vector<1x8x103xf32> to vector<8x103xf32>
    %12 = vector.extract_strided_slice %11 {offsets = [0, 6], sizes = [8, 97], strides = [1, 1]} : vector<8x103xf32> to vector<8x97xf32>
    %13 = arith.truncf %12 : vector<8x97xf32> to vector<8x97xbf16>
    %c0_7 = arith.constant 0 : index
    %c0_8 = arith.constant 0 : index
    %14 = vector.load %arg5[%c0_7, %c0_8] : memref<97x2xbf16, #tpu.memory_space<vmem>>, vector<97x2xbf16>
    %cst_9 = arith.constant dense<0.000000e+00> : vector<8x2xf32>
    %15 = tpu.matmul %13, %14, %cst_9 {dimension_numbers = #tpu.dot_dimension_numbers<[1], [0], [0], [1], [0, 0, 1, 1], [], []>} : vector<8x97xbf16>, vector<97x2xbf16>, vector<8x2xf32> -> vector<8x2xf32>
    %16 = vector.extract_strided_slice %11 {offsets = [0, 0], sizes = [8, 6], strides = [1, 1]} : vector<8x103xf32> to vector<8x6xf32>
    %17 = tpu.concatenate %9, %16, %15 in 1 : vector<8x24xf32>, vector<8x6xf32>, vector<8x2xf32> -> vector<8x32xf32>
    %c0_10 = arith.constant 0 : index
    %c0_11 = arith.constant 0 : index
    %18 = vector.load %arg3[%c0_10, %c0_11] : memref<8x32xf32, #tpu.memory_space<vmem>>, vector<8x32xf32>
    %19 = arith.addf %17, %18 : vector<8x32xf32>
    %20 = arith.truncf %19 : vector<8x32xf32> to vector<8x32xbf16>
    %c0_12 = arith.constant 0 : index
    %c0_13 = arith.constant 0 : index
    %c0_14 = arith.constant 0 : index
    %21 = vector.load %arg6[%c0_12, %c0_13, %c0_14] : memref<2x32x96xbf16, #tpu.memory_space<vmem>>, vector<1x32x96xbf16>
    %22 = vector.shape_cast %21 : vector<1x32x96xbf16> to vector<32x96xbf16>
    %cst_15 = arith.constant dense<0.000000e+00> : vector<8x96xf32>
    %23 = tpu.matmul %20, %22, %cst_15 {dimension_numbers = #tpu.dot_dimension_numbers<[1], [0], [0], [1], [0, 0, 1, 1], [], []>} : vector<8x32xbf16>, vector<32x96xbf16>, vector<8x96xf32> -> vector<8x96xf32>
    %c0_16 = arith.constant 0 : index
    %c0_17 = arith.constant 0 : index
    %c0_18 = arith.constant 0 : index
    %24 = vector.load %arg7[%c0_16, %c0_17, %c0_18] : memref<2x1x96xf32, #tpu.memory_space<vmem>>, vector<1x1x96xf32>
    %25 = vector.shape_cast %24 : vector<1x1x96xf32> to vector<1x96xf32>
    %26 = vector.broadcast %25 : vector<1x96xf32> to vector<8x96xf32>
    %27 = arith.addf %23, %26 : vector<8x96xf32>
    %28 = arith.truncf %27 : vector<8x96xf32> to vector<8x96xbf16>
    %29 = vector.extract_strided_slice %28 {offsets = [0, 0], sizes = [8, 8], strides = [1, 1]} : vector<8x96xbf16> to vector<8x8xbf16>
    %30 = vector.extract_strided_slice %28 {offsets = [0, 32], sizes = [8, 8], strides = [1, 1]} : vector<8x96xbf16> to vector<8x8xbf16>
    %31 = vector.extract_strided_slice %28 {offsets = [0, 64], sizes = [8, 8], strides = [1, 1]} : vector<8x96xbf16> to vector<8x8xbf16>
    %cst_19 = arith.constant dense<0.000000e+00> : vector<8x8xf32>
    %32 = tpu.matmul %29, %30, %cst_19 {dimension_numbers = #tpu.dot_dimension_numbers<[1], [1], [0], [0], [0, 0, 1, 0], [], []>} : vector<8x8xbf16>, vector<8x8xbf16>, vector<8x8xf32> -> vector<8x8xf32>
    %cst_20 = arith.constant dense<0xFF800000> : vector<8xf32>
    %33 = vector.multi_reduction <maximumf>, %32, %cst_20 [1] : vector<8x8xf32> to vector<8xf32>
    %34 = vector.shape_cast %33 : vector<8xf32> to vector<8x1xf32>
    %35 = vector.broadcast %34 : vector<8x1xf32> to vector<8x8xf32>
    %36 = arith.subf %32, %35 : vector<8x8xf32>
    %37 = math.exp %36 : vector<8x8xf32>
    %cst_21 = arith.constant dense<0.000000e+00> : vector<8xf32>
    %38 = vector.multi_reduction <add>, %37, %cst_21 [1] : vector<8x8xf32> to vector<8xf32>
    %39 = vector.shape_cast %38 : vector<8xf32> to vector<8x1xf32>
    %40 = tpu.reciprocal %39 {approx = true} : vector<8x1xf32> -> vector<8x1xf32>
    %41 = vector.broadcast %40 : vector<8x1xf32> to vector<8x8xf32>
    %42 = arith.mulf %37, %41 : vector<8x8xf32>
    %43 = arith.truncf %42 : vector<8x8xf32> to vector<8x8xbf16>
    %cst_22 = arith.constant dense<0.000000e+00> : vector<8x8xf32>
    %44 = tpu.matmul %43, %31, %cst_22 {dimension_numbers = #tpu.dot_dimension_numbers<[1], [0], [0], [1], [0, 0, 1, 1], [], []>} : vector<8x8xbf16>, vector<8x8xbf16>, vector<8x8xf32> -> vector<8x8xf32>
    %45 = vector.extract_strided_slice %28 {offsets = [0, 8], sizes = [8, 8], strides = [1, 1]} : vector<8x96xbf16> to vector<8x8xbf16>
    %46 = vector.extract_strided_slice %28 {offsets = [0, 40], sizes = [8, 8], strides = [1, 1]} : vector<8x96xbf16> to vector<8x8xbf16>
    %47 = vector.extract_strided_slice %28 {offsets = [0, 72], sizes = [8, 8], strides = [1, 1]} : vector<8x96xbf16> to vector<8x8xbf16>
    %cst_23 = arith.constant dense<0.000000e+00> : vector<8x8xf32>
    %48 = tpu.matmul %45, %46, %cst_23 {dimension_numbers = #tpu.dot_dimension_numbers<[1], [1], [0], [0], [0, 0, 1, 0], [], []>} : vector<8x8xbf16>, vector<8x8xbf16>, vector<8x8xf32> -> vector<8x8xf32>
    %cst_24 = arith.constant dense<0xFF800000> : vector<8xf32>
    %49 = vector.multi_reduction <maximumf>, %48, %cst_24 [1] : vector<8x8xf32> to vector<8xf32>
    %50 = vector.shape_cast %49 : vector<8xf32> to vector<8x1xf32>
    %51 = vector.broadcast %50 : vector<8x1xf32> to vector<8x8xf32>
    %52 = arith.subf %48, %51 : vector<8x8xf32>
    %53 = math.exp %52 : vector<8x8xf32>
    %cst_25 = arith.constant dense<0.000000e+00> : vector<8xf32>
    %54 = vector.multi_reduction <add>, %53, %cst_25 [1] : vector<8x8xf32> to vector<8xf32>
    %55 = vector.shape_cast %54 : vector<8xf32> to vector<8x1xf32>
    %56 = tpu.reciprocal %55 {approx = true} : vector<8x1xf32> -> vector<8x1xf32>
    %57 = vector.broadcast %56 : vector<8x1xf32> to vector<8x8xf32>
    %58 = arith.mulf %53, %57 : vector<8x8xf32>
    %59 = arith.truncf %58 : vector<8x8xf32> to vector<8x8xbf16>
    %cst_26 = arith.constant dense<0.000000e+00> : vector<8x8xf32>
    %60 = tpu.matmul %59, %47, %cst_26 {dimension_numbers = #tpu.dot_dimension_numbers<[1], [0], [0], [1], [0, 0, 1, 1], [], []>} : vector<8x8xbf16>, vector<8x8xbf16>, vector<8x8xf32> -> vector<8x8xf32>
    %61 = vector.extract_strided_slice %28 {offsets = [0, 16], sizes = [8, 8], strides = [1, 1]} : vector<8x96xbf16> to vector<8x8xbf16>
    %62 = vector.extract_strided_slice %28 {offsets = [0, 48], sizes = [8, 8], strides = [1, 1]} : vector<8x96xbf16> to vector<8x8xbf16>
    %63 = vector.extract_strided_slice %28 {offsets = [0, 80], sizes = [8, 8], strides = [1, 1]} : vector<8x96xbf16> to vector<8x8xbf16>
    %cst_27 = arith.constant dense<0.000000e+00> : vector<8x8xf32>
    %64 = tpu.matmul %61, %62, %cst_27 {dimension_numbers = #tpu.dot_dimension_numbers<[1], [1], [0], [0], [0, 0, 1, 0], [], []>} : vector<8x8xbf16>, vector<8x8xbf16>, vector<8x8xf32> -> vector<8x8xf32>
    %cst_28 = arith.constant dense<0xFF800000> : vector<8xf32>
    %65 = vector.multi_reduction <maximumf>, %64, %cst_28 [1] : vector<8x8xf32> to vector<8xf32>
    %66 = vector.shape_cast %65 : vector<8xf32> to vector<8x1xf32>
    %67 = vector.broadcast %66 : vector<8x1xf32> to vector<8x8xf32>
    %68 = arith.subf %64, %67 : vector<8x8xf32>
    %69 = math.exp %68 : vector<8x8xf32>
    %cst_29 = arith.constant dense<0.000000e+00> : vector<8xf32>
    %70 = vector.multi_reduction <add>, %69, %cst_29 [1] : vector<8x8xf32> to vector<8xf32>
    %71 = vector.shape_cast %70 : vector<8xf32> to vector<8x1xf32>
    %72 = tpu.reciprocal %71 {approx = true} : vector<8x1xf32> -> vector<8x1xf32>
    %73 = vector.broadcast %72 : vector<8x1xf32> to vector<8x8xf32>
    %74 = arith.mulf %69, %73 : vector<8x8xf32>
    %75 = arith.truncf %74 : vector<8x8xf32> to vector<8x8xbf16>
    %cst_30 = arith.constant dense<0.000000e+00> : vector<8x8xf32>
    %76 = tpu.matmul %75, %63, %cst_30 {dimension_numbers = #tpu.dot_dimension_numbers<[1], [0], [0], [1], [0, 0, 1, 1], [], []>} : vector<8x8xbf16>, vector<8x8xbf16>, vector<8x8xf32> -> vector<8x8xf32>
    %77 = vector.extract_strided_slice %28 {offsets = [0, 24], sizes = [8, 8], strides = [1, 1]} : vector<8x96xbf16> to vector<8x8xbf16>
    %78 = vector.extract_strided_slice %28 {offsets = [0, 56], sizes = [8, 8], strides = [1, 1]} : vector<8x96xbf16> to vector<8x8xbf16>
    %79 = vector.extract_strided_slice %28 {offsets = [0, 88], sizes = [8, 8], strides = [1, 1]} : vector<8x96xbf16> to vector<8x8xbf16>
    %cst_31 = arith.constant dense<0.000000e+00> : vector<8x8xf32>
    %80 = tpu.matmul %77, %78, %cst_31 {dimension_numbers = #tpu.dot_dimension_numbers<[1], [1], [0], [0], [0, 0, 1, 0], [], []>} : vector<8x8xbf16>, vector<8x8xbf16>, vector<8x8xf32> -> vector<8x8xf32>
    %cst_32 = arith.constant dense<0xFF800000> : vector<8xf32>
    %81 = vector.multi_reduction <maximumf>, %80, %cst_32 [1] : vector<8x8xf32> to vector<8xf32>
    %82 = vector.shape_cast %81 : vector<8xf32> to vector<8x1xf32>
    %83 = vector.broadcast %82 : vector<8x1xf32> to vector<8x8xf32>
    %84 = arith.subf %80, %83 : vector<8x8xf32>
    %85 = math.exp %84 : vector<8x8xf32>
    %cst_33 = arith.constant dense<0.000000e+00> : vector<8xf32>
    %86 = vector.multi_reduction <add>, %85, %cst_33 [1] : vector<8x8xf32> to vector<8xf32>
    %87 = vector.shape_cast %86 : vector<8xf32> to vector<8x1xf32>
    %88 = tpu.reciprocal %87 {approx = true} : vector<8x1xf32> -> vector<8x1xf32>
    %89 = vector.broadcast %88 : vector<8x1xf32> to vector<8x8xf32>
    %90 = arith.mulf %85, %89 : vector<8x8xf32>
    %91 = arith.truncf %90 : vector<8x8xf32> to vector<8x8xbf16>
    %cst_34 = arith.constant dense<0.000000e+00> : vector<8x8xf32>
    %92 = tpu.matmul %91, %79, %cst_34 {dimension_numbers = #tpu.dot_dimension_numbers<[1], [0], [0], [1], [0, 0, 1, 1], [], []>} : vector<8x8xbf16>, vector<8x8xbf16>, vector<8x8xf32> -> vector<8x8xf32>
    %93 = tpu.concatenate %44, %60, %76, %92 in 1 : vector<8x8xf32>, vector<8x8xf32>, vector<8x8xf32>, vector<8x8xf32> -> vector<8x32xf32>
    %94 = arith.truncf %93 : vector<8x32xf32> to vector<8x32xbf16>
    %c0_35 = arith.constant 0 : index
    %c0_36 = arith.constant 0 : index
    %c0_37 = arith.constant 0 : index
    %95 = vector.load %arg8[%c0_35, %c0_36, %c0_37] : memref<2x32x32xbf16, #tpu.memory_space<vmem>>, vector<1x32x32xbf16>
    %96 = vector.shape_cast %95 : vector<1x32x32xbf16> to vector<32x32xbf16>
    %cst_38 = arith.constant dense<0.000000e+00> : vector<8x32xf32>
    %97 = tpu.matmul %94, %96, %cst_38 {dimension_numbers = #tpu.dot_dimension_numbers<[1], [0], [0], [1], [0, 0, 1, 1], [], []>} : vector<8x32xbf16>, vector<32x32xbf16>, vector<8x32xf32> -> vector<8x32xf32>
    %c0_39 = arith.constant 0 : index
    %c0_40 = arith.constant 0 : index
    %c0_41 = arith.constant 0 : index
    %98 = vector.load %arg9[%c0_39, %c0_40, %c0_41] : memref<2x1x32xf32, #tpu.memory_space<vmem>>, vector<1x1x32xf32>
    %99 = vector.shape_cast %98 : vector<1x1x32xf32> to vector<1x32xf32>
    %100 = vector.broadcast %99 : vector<1x32xf32> to vector<8x32xf32>
    %101 = arith.addf %97, %100 : vector<8x32xf32>
    %102 = arith.addf %19, %101 : vector<8x32xf32>
    %c0_42 = arith.constant 0 : index
    %c0_43 = arith.constant 0 : index
    %c0_44 = arith.constant 0 : index
    %103 = vector.load %arg10[%c0_42, %c0_43, %c0_44] : memref<2x1x32xf32, #tpu.memory_space<vmem>>, vector<1x1x32xf32>
    %104 = vector.shape_cast %103 : vector<1x1x32xf32> to vector<1x32xf32>
    %c0_45 = arith.constant 0 : index
    %c0_46 = arith.constant 0 : index
    %c0_47 = arith.constant 0 : index
    %105 = vector.load %arg11[%c0_45, %c0_46, %c0_47] : memref<2x1x32xf32, #tpu.memory_space<vmem>>, vector<1x1x32xf32>
    %106 = vector.shape_cast %105 : vector<1x1x32xf32> to vector<1x32xf32>
    %cst_48 = arith.constant dense<0.000000e+00> : vector<8xf32>
    %107 = vector.multi_reduction <add>, %102, %cst_48 [1] : vector<8x32xf32> to vector<8xf32>
    %108 = vector.shape_cast %107 : vector<8xf32> to vector<8x1xf32>
    %cst_49 = arith.constant 3.200000e+01 : f32
    %109 = vector.broadcast %cst_49 : f32 to vector<8x1xf32>
    %110 = arith.divf %108, %109 : vector<8x1xf32>
    %111 = vector.broadcast %110 : vector<8x1xf32> to vector<8x32xf32>
    %112 = arith.subf %102, %111 : vector<8x32xf32>
    %113 = arith.mulf %112, %112 : vector<8x32xf32>
    %cst_50 = arith.constant dense<0.000000e+00> : vector<8xf32>
    %114 = vector.multi_reduction <add>, %113, %cst_50 [1] : vector<8x32xf32> to vector<8xf32>
    %115 = vector.shape_cast %114 : vector<8xf32> to vector<8x1xf32>
    %cst_51 = arith.constant 3.200000e+01 : f32
    %116 = vector.broadcast %cst_51 : f32 to vector<8x1xf32>
    %117 = arith.divf %115, %116 : vector<8x1xf32>
    %118 = vector.broadcast %110 : vector<8x1xf32> to vector<8x32xf32>
    %119 = arith.subf %102, %118 : vector<8x32xf32>
    %cst_52 = arith.constant 9.99999996E-13 : f32
    %120 = vector.broadcast %cst_52 : f32 to vector<8x1xf32>
    %121 = arith.addf %117, %120 : vector<8x1xf32>
    %122 = math.rsqrt %121 : vector<8x1xf32>
    %123 = vector.broadcast %122 : vector<8x1xf32> to vector<8x32xf32>
    %124 = arith.mulf %119, %123 : vector<8x32xf32>
    %125 = vector.broadcast %104 : vector<1x32xf32> to vector<8x32xf32>
    %126 = arith.mulf %124, %125 : vector<8x32xf32>
    %127 = vector.broadcast %106 : vector<1x32xf32> to vector<8x32xf32>
    %128 = arith.addf %126, %127 : vector<8x32xf32>
    %129 = arith.truncf %128 : vector<8x32xf32> to vector<8x32xbf16>
    %c0_53 = arith.constant 0 : index
    %c0_54 = arith.constant 0 : index
    %c0_55 = arith.constant 0 : index
    %130 = vector.load %arg12[%c0_53, %c0_54, %c0_55] : memref<2x32x128xbf16, #tpu.memory_space<vmem>>, vector<1x32x128xbf16>
    %131 = vector.shape_cast %130 : vector<1x32x128xbf16> to vector<32x128xbf16>
    %cst_56 = arith.constant dense<0.000000e+00> : vector<8x128xf32>
    %132 = tpu.matmul %129, %131, %cst_56 {dimension_numbers = #tpu.dot_dimension_numbers<[1], [0], [0], [1], [0, 0, 1, 1], [], []>} : vector<8x32xbf16>, vector<32x128xbf16>, vector<8x128xf32> -> vector<8x128xf32>
    %c0_57 = arith.constant 0 : index
    %c0_58 = arith.constant 0 : index
    %c0_59 = arith.constant 0 : index
    %133 = vector.load %arg13[%c0_57, %c0_58, %c0_59] : memref<2x1x128xf32, #tpu.memory_space<vmem>>, vector<1x1x128xf32>
    %134 = vector.shape_cast %133 : vector<1x1x128xf32> to vector<1x128xf32>
    %135 = vector.broadcast %134 : vector<1x128xf32> to vector<8x128xf32>
    %136 = arith.addf %132, %135 : vector<8x128xf32>
    %137 = arith.mulf %136, %136 : vector<8x128xf32>
    %138 = arith.mulf %136, %137 : vector<8x128xf32>
    %cst_60 = arith.constant 4.471500e-02 : f32
    %139 = vector.broadcast %cst_60 : f32 to vector<8x128xf32>
    %140 = arith.mulf %139, %138 : vector<8x128xf32>
    %141 = arith.addf %136, %140 : vector<8x128xf32>
    %cst_61 = arith.constant 0.797884583 : f32
    %142 = vector.broadcast %cst_61 : f32 to vector<8x128xf32>
    %143 = arith.mulf %142, %141 : vector<8x128xf32>
    %144 = math.tanh %143 : vector<8x128xf32>
    %cst_62 = arith.constant 1.000000e+00 : f32
    %145 = vector.broadcast %cst_62 : f32 to vector<8x128xf32>
    %146 = arith.addf %145, %144 : vector<8x128xf32>
    %cst_63 = arith.constant 5.000000e-01 : f32
    %147 = vector.broadcast %cst_63 : f32 to vector<8x128xf32>
    %148 = arith.mulf %147, %146 : vector<8x128xf32>
    %149 = arith.mulf %136, %148 : vector<8x128xf32>
    %150 = arith.truncf %149 : vector<8x128xf32> to vector<8x128xbf16>
    %c0_64 = arith.constant 0 : index
    %c0_65 = arith.constant 0 : index
    %c0_66 = arith.constant 0 : index
    %151 = vector.load %arg14[%c0_64, %c0_65, %c0_66] : memref<2x128x32xbf16, #tpu.memory_space<vmem>>, vector<1x128x32xbf16>
    %152 = vector.shape_cast %151 : vector<1x128x32xbf16> to vector<128x32xbf16>
    %cst_67 = arith.constant dense<0.000000e+00> : vector<8x32xf32>
    %153 = tpu.matmul %150, %152, %cst_67 {dimension_numbers = #tpu.dot_dimension_numbers<[1], [0], [0], [1], [0, 0, 1, 1], [], []>} : vector<8x128xbf16>, vector<128x32xbf16>, vector<8x32xf32> -> vector<8x32xf32>
    %c0_68 = arith.constant 0 : index
    %c0_69 = arith.constant 0 : index
    %c0_70 = arith.constant 0 : index
    %154 = vector.load %arg15[%c0_68, %c0_69, %c0_70] : memref<2x1x32xf32, #tpu.memory_space<vmem>>, vector<1x1x32xf32>
    %155 = vector.shape_cast %154 : vector<1x1x32xf32> to vector<1x32xf32>
    %156 = vector.broadcast %155 : vector<1x32xf32> to vector<8x32xf32>
    %157 = arith.addf %153, %156 : vector<8x32xf32>
    %158 = arith.addf %128, %157 : vector<8x32xf32>
    %c0_71 = arith.constant 0 : index
    %c0_72 = arith.constant 0 : index
    %c0_73 = arith.constant 0 : index
    %159 = vector.load %arg16[%c0_71, %c0_72, %c0_73] : memref<2x1x32xf32, #tpu.memory_space<vmem>>, vector<1x1x32xf32>
    %160 = vector.shape_cast %159 : vector<1x1x32xf32> to vector<1x32xf32>
    %c0_74 = arith.constant 0 : index
    %c0_75 = arith.constant 0 : index
    %c0_76 = arith.constant 0 : index
    %161 = vector.load %arg17[%c0_74, %c0_75, %c0_76] : memref<2x1x32xf32, #tpu.memory_space<vmem>>, vector<1x1x32xf32>
    %162 = vector.shape_cast %161 : vector<1x1x32xf32> to vector<1x32xf32>
    %cst_77 = arith.constant dense<0.000000e+00> : vector<8xf32>
    %163 = vector.multi_reduction <add>, %158, %cst_77 [1] : vector<8x32xf32> to vector<8xf32>
    %164 = vector.shape_cast %163 : vector<8xf32> to vector<8x1xf32>
    %cst_78 = arith.constant 3.200000e+01 : f32
    %165 = vector.broadcast %cst_78 : f32 to vector<8x1xf32>
    %166 = arith.divf %164, %165 : vector<8x1xf32>
    %167 = vector.broadcast %166 : vector<8x1xf32> to vector<8x32xf32>
    %168 = arith.subf %158, %167 : vector<8x32xf32>
    %169 = arith.mulf %168, %168 : vector<8x32xf32>
    %cst_79 = arith.constant dense<0.000000e+00> : vector<8xf32>
    %170 = vector.multi_reduction <add>, %169, %cst_79 [1] : vector<8x32xf32> to vector<8xf32>
    %171 = vector.shape_cast %170 : vector<8xf32> to vector<8x1xf32>
    %cst_80 = arith.constant 3.200000e+01 : f32
    %172 = vector.broadcast %cst_80 : f32 to vector<8x1xf32>
    %173 = arith.divf %171, %172 : vector<8x1xf32>
    %174 = vector.broadcast %166 : vector<8x1xf32> to vector<8x32xf32>
    %175 = arith.subf %158, %174 : vector<8x32xf32>
    %cst_81 = arith.constant 9.99999996E-13 : f32
    %176 = vector.broadcast %cst_81 : f32 to vector<8x1xf32>
    %177 = arith.addf %173, %176 : vector<8x1xf32>
    %178 = math.rsqrt %177 : vector<8x1xf32>
    %179 = vector.broadcast %178 : vector<8x1xf32> to vector<8x32xf32>
    %180 = arith.mulf %175, %179 : vector<8x32xf32>
    %181 = vector.broadcast %160 : vector<1x32xf32> to vector<8x32xf32>
    %182 = arith.mulf %180, %181 : vector<8x32xf32>
    %183 = vector.broadcast %162 : vector<1x32xf32> to vector<8x32xf32>
    %184 = arith.addf %182, %183 : vector<8x32xf32>
    %185 = arith.truncf %184 : vector<8x32xf32> to vector<8x32xbf16>
    %c1 = arith.constant 1 : index
    %c0_82 = arith.constant 0 : index
    %c0_83 = arith.constant 0 : index
    %186 = vector.load %arg6[%c1, %c0_82, %c0_83] : memref<2x32x96xbf16, #tpu.memory_space<vmem>>, vector<1x32x96xbf16>
    %187 = vector.shape_cast %186 : vector<1x32x96xbf16> to vector<32x96xbf16>
    %cst_84 = arith.constant dense<0.000000e+00> : vector<8x96xf32>
    %188 = tpu.matmul %185, %187, %cst_84 {dimension_numbers = #tpu.dot_dimension_numbers<[1], [0], [0], [1], [0, 0, 1, 1], [], []>} : vector<8x32xbf16>, vector<32x96xbf16>, vector<8x96xf32> -> vector<8x96xf32>
    %c1_85 = arith.constant 1 : index
    %c0_86 = arith.constant 0 : index
    %c0_87 = arith.constant 0 : index
    %189 = vector.load %arg7[%c1_85, %c0_86, %c0_87] : memref<2x1x96xf32, #tpu.memory_space<vmem>>, vector<1x1x96xf32>
    %190 = vector.shape_cast %189 : vector<1x1x96xf32> to vector<1x96xf32>
    %191 = vector.broadcast %190 : vector<1x96xf32> to vector<8x96xf32>
    %192 = arith.addf %188, %191 : vector<8x96xf32>
    %193 = arith.truncf %192 : vector<8x96xf32> to vector<8x96xbf16>
    %194 = vector.extract_strided_slice %193 {offsets = [0, 0], sizes = [8, 8], strides = [1, 1]} : vector<8x96xbf16> to vector<8x8xbf16>
    %195 = vector.extract_strided_slice %193 {offsets = [0, 32], sizes = [8, 8], strides = [1, 1]} : vector<8x96xbf16> to vector<8x8xbf16>
    %196 = vector.extract_strided_slice %193 {offsets = [0, 64], sizes = [8, 8], strides = [1, 1]} : vector<8x96xbf16> to vector<8x8xbf16>
    %cst_88 = arith.constant dense<0.000000e+00> : vector<8x8xf32>
    %197 = tpu.matmul %194, %195, %cst_88 {dimension_numbers = #tpu.dot_dimension_numbers<[1], [1], [0], [0], [0, 0, 1, 0], [], []>} : vector<8x8xbf16>, vector<8x8xbf16>, vector<8x8xf32> -> vector<8x8xf32>
    %cst_89 = arith.constant dense<0xFF800000> : vector<8xf32>
    %198 = vector.multi_reduction <maximumf>, %197, %cst_89 [1] : vector<8x8xf32> to vector<8xf32>
    %199 = vector.shape_cast %198 : vector<8xf32> to vector<8x1xf32>
    %200 = vector.broadcast %199 : vector<8x1xf32> to vector<8x8xf32>
    %201 = arith.subf %197, %200 : vector<8x8xf32>
    %202 = math.exp %201 : vector<8x8xf32>
    %cst_90 = arith.constant dense<0.000000e+00> : vector<8xf32>
    %203 = vector.multi_reduction <add>, %202, %cst_90 [1] : vector<8x8xf32> to vector<8xf32>
    %204 = vector.shape_cast %203 : vector<8xf32> to vector<8x1xf32>
    %205 = tpu.reciprocal %204 {approx = true} : vector<8x1xf32> -> vector<8x1xf32>
    %206 = vector.broadcast %205 : vector<8x1xf32> to vector<8x8xf32>
    %207 = arith.mulf %202, %206 : vector<8x8xf32>
    %208 = arith.truncf %207 : vector<8x8xf32> to vector<8x8xbf16>
    %cst_91 = arith.constant dense<0.000000e+00> : vector<8x8xf32>
    %209 = tpu.matmul %208, %196, %cst_91 {dimension_numbers = #tpu.dot_dimension_numbers<[1], [0], [0], [1], [0, 0, 1, 1], [], []>} : vector<8x8xbf16>, vector<8x8xbf16>, vector<8x8xf32> -> vector<8x8xf32>
    %210 = vector.extract_strided_slice %193 {offsets = [0, 8], sizes = [8, 8], strides = [1, 1]} : vector<8x96xbf16> to vector<8x8xbf16>
    %211 = vector.extract_strided_slice %193 {offsets = [0, 40], sizes = [8, 8], strides = [1, 1]} : vector<8x96xbf16> to vector<8x8xbf16>
    %212 = vector.extract_strided_slice %193 {offsets = [0, 72], sizes = [8, 8], strides = [1, 1]} : vector<8x96xbf16> to vector<8x8xbf16>
    %cst_92 = arith.constant dense<0.000000e+00> : vector<8x8xf32>
    %213 = tpu.matmul %210, %211, %cst_92 {dimension_numbers = #tpu.dot_dimension_numbers<[1], [1], [0], [0], [0, 0, 1, 0], [], []>} : vector<8x8xbf16>, vector<8x8xbf16>, vector<8x8xf32> -> vector<8x8xf32>
    %cst_93 = arith.constant dense<0xFF800000> : vector<8xf32>
    %214 = vector.multi_reduction <maximumf>, %213, %cst_93 [1] : vector<8x8xf32> to vector<8xf32>
    %215 = vector.shape_cast %214 : vector<8xf32> to vector<8x1xf32>
    %216 = vector.broadcast %215 : vector<8x1xf32> to vector<8x8xf32>
    %217 = arith.subf %213, %216 : vector<8x8xf32>
    %218 = math.exp %217 : vector<8x8xf32>
    %cst_94 = arith.constant dense<0.000000e+00> : vector<8xf32>
    %219 = vector.multi_reduction <add>, %218, %cst_94 [1] : vector<8x8xf32> to vector<8xf32>
    %220 = vector.shape_cast %219 : vector<8xf32> to vector<8x1xf32>
    %221 = tpu.reciprocal %220 {approx = true} : vector<8x1xf32> -> vector<8x1xf32>
    %222 = vector.broadcast %221 : vector<8x1xf32> to vector<8x8xf32>
    %223 = arith.mulf %218, %222 : vector<8x8xf32>
    %224 = arith.truncf %223 : vector<8x8xf32> to vector<8x8xbf16>
    %cst_95 = arith.constant dense<0.000000e+00> : vector<8x8xf32>
    %225 = tpu.matmul %224, %212, %cst_95 {dimension_numbers = #tpu.dot_dimension_numbers<[1], [0], [0], [1], [0, 0, 1, 1], [], []>} : vector<8x8xbf16>, vector<8x8xbf16>, vector<8x8xf32> -> vector<8x8xf32>
    %226 = vector.extract_strided_slice %193 {offsets = [0, 16], sizes = [8, 8], strides = [1, 1]} : vector<8x96xbf16> to vector<8x8xbf16>
    %227 = vector.extract_strided_slice %193 {offsets = [0, 48], sizes = [8, 8], strides = [1, 1]} : vector<8x96xbf16> to vector<8x8xbf16>
    %228 = vector.extract_strided_slice %193 {offsets = [0, 80], sizes = [8, 8], strides = [1, 1]} : vector<8x96xbf16> to vector<8x8xbf16>
    %cst_96 = arith.constant dense<0.000000e+00> : vector<8x8xf32>
    %229 = tpu.matmul %226, %227, %cst_96 {dimension_numbers = #tpu.dot_dimension_numbers<[1], [1], [0], [0], [0, 0, 1, 0], [], []>} : vector<8x8xbf16>, vector<8x8xbf16>, vector<8x8xf32> -> vector<8x8xf32>
    %cst_97 = arith.constant dense<0xFF800000> : vector<8xf32>
    %230 = vector.multi_reduction <maximumf>, %229, %cst_97 [1] : vector<8x8xf32> to vector<8xf32>
    %231 = vector.shape_cast %230 : vector<8xf32> to vector<8x1xf32>
    %232 = vector.broadcast %231 : vector<8x1xf32> to vector<8x8xf32>
    %233 = arith.subf %229, %232 : vector<8x8xf32>
    %234 = math.exp %233 : vector<8x8xf32>
    %cst_98 = arith.constant dense<0.000000e+00> : vector<8xf32>
    %235 = vector.multi_reduction <add>, %234, %cst_98 [1] : vector<8x8xf32> to vector<8xf32>
    %236 = vector.shape_cast %235 : vector<8xf32> to vector<8x1xf32>
    %237 = tpu.reciprocal %236 {approx = true} : vector<8x1xf32> -> vector<8x1xf32>
    %238 = vector.broadcast %237 : vector<8x1xf32> to vector<8x8xf32>
    %239 = arith.mulf %234, %238 : vector<8x8xf32>
    %240 = arith.truncf %239 : vector<8x8xf32> to vector<8x8xbf16>
    %cst_99 = arith.constant dense<0.000000e+00> : vector<8x8xf32>
    %241 = tpu.matmul %240, %228, %cst_99 {dimension_numbers = #tpu.dot_dimension_numbers<[1], [0], [0], [1], [0, 0, 1, 1], [], []>} : vector<8x8xbf16>, vector<8x8xbf16>, vector<8x8xf32> -> vector<8x8xf32>
    %242 = vector.extract_strided_slice %193 {offsets = [0, 24], sizes = [8, 8], strides = [1, 1]} : vector<8x96xbf16> to vector<8x8xbf16>
    %243 = vector.extract_strided_slice %193 {offsets = [0, 56], sizes = [8, 8], strides = [1, 1]} : vector<8x96xbf16> to vector<8x8xbf16>
    %244 = vector.extract_strided_slice %193 {offsets = [0, 88], sizes = [8, 8], strides = [1, 1]} : vector<8x96xbf16> to vector<8x8xbf16>
    %cst_100 = arith.constant dense<0.000000e+00> : vector<8x8xf32>
    %245 = tpu.matmul %242, %243, %cst_100 {dimension_numbers = #tpu.dot_dimension_numbers<[1], [1], [0], [0], [0, 0, 1, 0], [], []>} : vector<8x8xbf16>, vector<8x8xbf16>, vector<8x8xf32> -> vector<8x8xf32>
    %cst_101 = arith.constant dense<0xFF800000> : vector<8xf32>
    %246 = vector.multi_reduction <maximumf>, %245, %cst_101 [1] : vector<8x8xf32> to vector<8xf32>
    %247 = vector.shape_cast %246 : vector<8xf32> to vector<8x1xf32>
    %248 = vector.broadcast %247 : vector<8x1xf32> to vector<8x8xf32>
    %249 = arith.subf %245, %248 : vector<8x8xf32>
    %250 = math.exp %249 : vector<8x8xf32>
    %cst_102 = arith.constant dense<0.000000e+00> : vector<8xf32>
    %251 = vector.multi_reduction <add>, %250, %cst_102 [1] : vector<8x8xf32> to vector<8xf32>
    %252 = vector.shape_cast %251 : vector<8xf32> to vector<8x1xf32>
    %253 = tpu.reciprocal %252 {approx = true} : vector<8x1xf32> -> vector<8x1xf32>
    %254 = vector.broadcast %253 : vector<8x1xf32> to vector<8x8xf32>
    %255 = arith.mulf %250, %254 : vector<8x8xf32>
    %256 = arith.truncf %255 : vector<8x8xf32> to vector<8x8xbf16>
    %cst_103 = arith.constant dense<0.000000e+00> : vector<8x8xf32>
    %257 = tpu.matmul %256, %244, %cst_103 {dimension_numbers = #tpu.dot_dimension_numbers<[1], [0], [0], [1], [0, 0, 1, 1], [], []>} : vector<8x8xbf16>, vector<8x8xbf16>, vector<8x8xf32> -> vector<8x8xf32>
    %258 = tpu.concatenate %209, %225, %241, %257 in 1 : vector<8x8xf32>, vector<8x8xf32>, vector<8x8xf32>, vector<8x8xf32> -> vector<8x32xf32>
    %259 = arith.truncf %258 : vector<8x32xf32> to vector<8x32xbf16>
    %c1_104 = arith.constant 1 : index
    %c0_105 = arith.constant 0 : index
    %c0_106 = arith.constant 0 : index
    %260 = vector.load %arg8[%c1_104, %c0_105, %c0_106] : memref<2x32x32xbf16, #tpu.memory_space<vmem>>, vector<1x32x32xbf16>
    %261 = vector.shape_cast %260 : vector<1x32x32xbf16> to vector<32x32xbf16>
    %cst_107 = arith.constant dense<0.000000e+00> : vector<8x32xf32>
    %262 = tpu.matmul %259, %261, %cst_107 {dimension_numbers = #tpu.dot_dimension_numbers<[1], [0], [0], [1], [0, 0, 1, 1], [], []>} : vector<8x32xbf16>, vector<32x32xbf16>, vector<8x32xf32> -> vector<8x32xf32>
    %c1_108 = arith.constant 1 : index
    %c0_109 = arith.constant 0 : index
    %c0_110 = arith.constant 0 : index
    %263 = vector.load %arg9[%c1_108, %c0_109, %c0_110] : memref<2x1x32xf32, #tpu.memory_space<vmem>>, vector<1x1x32xf32>
    %264 = vector.shape_cast %263 : vector<1x1x32xf32> to vector<1x32xf32>
    %265 = vector.broadcast %264 : vector<1x32xf32> to vector<8x32xf32>
    %266 = arith.addf %262, %265 : vector<8x32xf32>
    %267 = arith.addf %184, %266 : vector<8x32xf32>
    %c1_111 = arith.constant 1 : index
    %c0_112 = arith.constant 0 : index
    %c0_113 = arith.constant 0 : index
    %268 = vector.load %arg10[%c1_111, %c0_112, %c0_113] : memref<2x1x32xf32, #tpu.memory_space<vmem>>, vector<1x1x32xf32>
    %269 = vector.shape_cast %268 : vector<1x1x32xf32> to vector<1x32xf32>
    %c1_114 = arith.constant 1 : index
    %c0_115 = arith.constant 0 : index
    %c0_116 = arith.constant 0 : index
    %270 = vector.load %arg11[%c1_114, %c0_115, %c0_116] : memref<2x1x32xf32, #tpu.memory_space<vmem>>, vector<1x1x32xf32>
    %271 = vector.shape_cast %270 : vector<1x1x32xf32> to vector<1x32xf32>
    %cst_117 = arith.constant dense<0.000000e+00> : vector<8xf32>
    %272 = vector.multi_reduction <add>, %267, %cst_117 [1] : vector<8x32xf32> to vector<8xf32>
    %273 = vector.shape_cast %272 : vector<8xf32> to vector<8x1xf32>
    %cst_118 = arith.constant 3.200000e+01 : f32
    %274 = vector.broadcast %cst_118 : f32 to vector<8x1xf32>
    %275 = arith.divf %273, %274 : vector<8x1xf32>
    %276 = vector.broadcast %275 : vector<8x1xf32> to vector<8x32xf32>
    %277 = arith.subf %267, %276 : vector<8x32xf32>
    %278 = arith.mulf %277, %277 : vector<8x32xf32>
    %cst_119 = arith.constant dense<0.000000e+00> : vector<8xf32>
    %279 = vector.multi_reduction <add>, %278, %cst_119 [1] : vector<8x32xf32> to vector<8xf32>
    %280 = vector.shape_cast %279 : vector<8xf32> to vector<8x1xf32>
    %cst_120 = arith.constant 3.200000e+01 : f32
    %281 = vector.broadcast %cst_120 : f32 to vector<8x1xf32>
    %282 = arith.divf %280, %281 : vector<8x1xf32>
    %283 = vector.broadcast %275 : vector<8x1xf32> to vector<8x32xf32>
    %284 = arith.subf %267, %283 : vector<8x32xf32>
    %cst_121 = arith.constant 9.99999996E-13 : f32
    %285 = vector.broadcast %cst_121 : f32 to vector<8x1xf32>
    %286 = arith.addf %282, %285 : vector<8x1xf32>
    %287 = math.rsqrt %286 : vector<8x1xf32>
    %288 = vector.broadcast %287 : vector<8x1xf32> to vector<8x32xf32>
    %289 = arith.mulf %284, %288 : vector<8x32xf32>
    %290 = vector.broadcast %269 : vector<1x32xf32> to vector<8x32xf32>
    %291 = arith.mulf %289, %290 : vector<8x32xf32>
    %292 = vector.broadcast %271 : vector<1x32xf32> to vector<8x32xf32>
    %293 = arith.addf %291, %292 : vector<8x32xf32>
    %294 = arith.truncf %293 : vector<8x32xf32> to vector<8x32xbf16>
    %c1_122 = arith.constant 1 : index
    %c0_123 = arith.constant 0 : index
    %c0_124 = arith.constant 0 : index
    %295 = vector.load %arg12[%c1_122, %c0_123, %c0_124] : memref<2x32x128xbf16, #tpu.memory_space<vmem>>, vector<1x32x128xbf16>
    %296 = vector.shape_cast %295 : vector<1x32x128xbf16> to vector<32x128xbf16>
    %cst_125 = arith.constant dense<0.000000e+00> : vector<8x128xf32>
    %297 = tpu.matmul %294, %296, %cst_125 {dimension_numbers = #tpu.dot_dimension_numbers<[1], [0], [0], [1], [0, 0, 1, 1], [], []>} : vector<8x32xbf16>, vector<32x128xbf16>, vector<8x128xf32> -> vector<8x128xf32>
    %c1_126 = arith.constant 1 : index
    %c0_127 = arith.constant 0 : index
    %c0_128 = arith.constant 0 : index
    %298 = vector.load %arg13[%c1_126, %c0_127, %c0_128] : memref<2x1x128xf32, #tpu.memory_space<vmem>>, vector<1x1x128xf32>
    %299 = vector.shape_cast %298 : vector<1x1x128xf32> to vector<1x128xf32>
    %300 = vector.broadcast %299 : vector<1x128xf32> to vector<8x128xf32>
    %301 = arith.addf %297, %300 : vector<8x128xf32>
    %302 = arith.mulf %301, %301 : vector<8x128xf32>
    %303 = arith.mulf %301, %302 : vector<8x128xf32>
    %cst_129 = arith.constant 4.471500e-02 : f32
    %304 = vector.broadcast %cst_129 : f32 to vector<8x128xf32>
    %305 = arith.mulf %304, %303 : vector<8x128xf32>
    %306 = arith.addf %301, %305 : vector<8x128xf32>
    %cst_130 = arith.constant 0.797884583 : f32
    %307 = vector.broadcast %cst_130 : f32 to vector<8x128xf32>
    %308 = arith.mulf %307, %306 : vector<8x128xf32>
    %309 = math.tanh %308 : vector<8x128xf32>
    %cst_131 = arith.constant 1.000000e+00 : f32
    %310 = vector.broadcast %cst_131 : f32 to vector<8x128xf32>
    %311 = arith.addf %310, %309 : vector<8x128xf32>
    %cst_132 = arith.constant 5.000000e-01 : f32
    %312 = vector.broadcast %cst_132 : f32 to vector<8x128xf32>
    %313 = arith.mulf %312, %311 : vector<8x128xf32>
    %314 = arith.mulf %301, %313 : vector<8x128xf32>
    %315 = arith.truncf %314 : vector<8x128xf32> to vector<8x128xbf16>
    %c1_133 = arith.constant 1 : index
    %c0_134 = arith.constant 0 : index
    %c0_135 = arith.constant 0 : index
    %316 = vector.load %arg14[%c1_133, %c0_134, %c0_135] : memref<2x128x32xbf16, #tpu.memory_space<vmem>>, vector<1x128x32xbf16>
    %317 = vector.shape_cast %316 : vector<1x128x32xbf16> to vector<128x32xbf16>
    %cst_136 = arith.constant dense<0.000000e+00> : vector<8x32xf32>
    %318 = tpu.matmul %315, %317, %cst_136 {dimension_numbers = #tpu.dot_dimension_numbers<[1], [0], [0], [1], [0, 0, 1, 1], [], []>} : vector<8x128xbf16>, vector<128x32xbf16>, vector<8x32xf32> -> vector<8x32xf32>
    %c1_137 = arith.constant 1 : index
    %c0_138 = arith.constant 0 : index
    %c0_139 = arith.constant 0 : index
    %319 = vector.load %arg15[%c1_137, %c0_138, %c0_139] : memref<2x1x32xf32, #tpu.memory_space<vmem>>, vector<1x1x32xf32>
    %320 = vector.shape_cast %319 : vector<1x1x32xf32> to vector<1x32xf32>
    %321 = vector.broadcast %320 : vector<1x32xf32> to vector<8x32xf32>
    %322 = arith.addf %318, %321 : vector<8x32xf32>
    %323 = arith.addf %293, %322 : vector<8x32xf32>
    %c1_140 = arith.constant 1 : index
    %c0_141 = arith.constant 0 : index
    %c0_142 = arith.constant 0 : index
    %324 = vector.load %arg16[%c1_140, %c0_141, %c0_142] : memref<2x1x32xf32, #tpu.memory_space<vmem>>, vector<1x1x32xf32>
    %325 = vector.shape_cast %324 : vector<1x1x32xf32> to vector<1x32xf32>
    %c1_143 = arith.constant 1 : index
    %c0_144 = arith.constant 0 : index
    %c0_145 = arith.constant 0 : index
    %326 = vector.load %arg17[%c1_143, %c0_144, %c0_145] : memref<2x1x32xf32, #tpu.memory_space<vmem>>, vector<1x1x32xf32>
    %327 = vector.shape_cast %326 : vector<1x1x32xf32> to vector<1x32xf32>
    %cst_146 = arith.constant dense<0.000000e+00> : vector<8xf32>
    %328 = vector.multi_reduction <add>, %323, %cst_146 [1] : vector<8x32xf32> to vector<8xf32>
    %329 = vector.shape_cast %328 : vector<8xf32> to vector<8x1xf32>
    %cst_147 = arith.constant 3.200000e+01 : f32
    %330 = vector.broadcast %cst_147 : f32 to vector<8x1xf32>
    %331 = arith.divf %329, %330 : vector<8x1xf32>
    %332 = vector.broadcast %331 : vector<8x1xf32> to vector<8x32xf32>
    %333 = arith.subf %323, %332 : vector<8x32xf32>
    %334 = arith.mulf %333, %333 : vector<8x32xf32>
    %cst_148 = arith.constant dense<0.000000e+00> : vector<8xf32>
    %335 = vector.multi_reduction <add>, %334, %cst_148 [1] : vector<8x32xf32> to vector<8xf32>
    %336 = vector.shape_cast %335 : vector<8xf32> to vector<8x1xf32>
    %cst_149 = arith.constant 3.200000e+01 : f32
    %337 = vector.broadcast %cst_149 : f32 to vector<8x1xf32>
    %338 = arith.divf %336, %337 : vector<8x1xf32>
    %339 = vector.broadcast %331 : vector<8x1xf32> to vector<8x32xf32>
    %340 = arith.subf %323, %339 : vector<8x32xf32>
    %cst_150 = arith.constant 9.99999996E-13 : f32
    %341 = vector.broadcast %cst_150 : f32 to vector<8x1xf32>
    %342 = arith.addf %338, %341 : vector<8x1xf32>
    %343 = math.rsqrt %342 : vector<8x1xf32>
    %344 = vector.broadcast %343 : vector<8x1xf32> to vector<8x32xf32>
    %345 = arith.mulf %340, %344 : vector<8x32xf32>
    %346 = vector.broadcast %325 : vector<1x32xf32> to vector<8x32xf32>
    %347 = arith.mulf %345, %346 : vector<8x32xf32>
    %348 = vector.broadcast %327 : vector<1x32xf32> to vector<8x32xf32>
    %349 = arith.addf %347, %348 : vector<8x32xf32>
    %cst_151 = arith.constant 2.000000e-01 : f32
    %350 = vector.broadcast %cst_151 : f32 to vector<8x32xf32>
    %351 = arith.mulf %350, %17 : vector<8x32xf32>
    %352 = arith.addf %349, %351 : vector<8x32xf32>
    %c0_152 = arith.constant 0 : index
    %c0_153 = arith.constant 0 : index
    %353 = vector.load %arg18[%c0_152, %c0_153] : memref<1x32xf32, #tpu.memory_space<vmem>>, vector<1x32xf32>
    %354 = vector.broadcast %353 : vector<1x32xf32> to vector<8x32xf32>
    %355 = arith.mulf %352, %354 : vector<8x32xf32>
    %cst_154 = arith.constant dense<0.000000e+00> : vector<8xf32>
    %356 = vector.multi_reduction <add>, %355, %cst_154 [1] : vector<8x32xf32> to vector<8xf32>
    %357 = vector.shape_cast %356 : vector<8xf32> to vector<8x1xf32>
    %cst_155 = arith.constant dense<0xFF800000> : vector<1xf32>
    %358 = vector.multi_reduction <maximumf>, %357, %cst_155 [0] : vector<8x1xf32> to vector<1xf32>
    %359 = vector.shape_cast %358 : vector<1xf32> to vector<1x1xf32>
    %360 = vector.broadcast %359 : vector<1x1xf32> to vector<8x1xf32>
    %361 = arith.subf %357, %360 : vector<8x1xf32>
    %362 = math.exp %361 : vector<8x1xf32>
    %cst_156 = arith.constant dense<0.000000e+00> : vector<1xf32>
    %363 = vector.multi_reduction <add>, %362, %cst_156 [0] : vector<8x1xf32> to vector<1xf32>
    %364 = vector.shape_cast %363 : vector<1xf32> to vector<1x1xf32>
    %365 = tpu.reciprocal %364 {approx = true} : vector<1x1xf32> -> vector<1x1xf32>
    %366 = vector.broadcast %365 : vector<1x1xf32> to vector<8x1xf32>
    %367 = arith.mulf %362, %366 : vector<8x1xf32>
    %368 = vector.broadcast %367 : vector<8x1xf32> to vector<8x32xf32>
    %369 = arith.mulf %352, %368 : vector<8x32xf32>
    %cst_157 = arith.constant dense<0.000000e+00> : vector<32xf32>
    %370 = vector.multi_reduction <add>, %369, %cst_157 [0] : vector<8x32xf32> to vector<32xf32>
    %371 = vector.shape_cast %370 : vector<32xf32> to vector<1x32xf32>
    %c0_158 = arith.constant 0 : index
    %c0_159 = arith.constant 0 : index
    %372 = memref.load %arg20[%c0_158, %c0_159] : memref<1x1xf32, #tpu.memory_space<smem>>
    %cst_160 = arith.constant 0.000000e+00 : f32
    %373 = vector.broadcast %cst_160 : f32 to vector<1x32xf32>
    %374 = arith.cmpf oge, %371, %373 : vector<1x32xf32>
    %375 = vector.broadcast %372 : f32 to vector<1x32xf32>
    %376 = arith.mulf %375, %371 : vector<1x32xf32>
    %377 = arith.select %374, %371, %376 : vector<1x32xi1>, vector<1x32xf32>
    %c0_161 = arith.constant 0 : index
    %c0_162 = arith.constant 0 : index
    %378 = vector.load %arg19[%c0_161, %c0_162] : memref<1x32xf32, #tpu.memory_space<vmem>>, vector<1x32xf32>
    %379 = arith.mulf %377, %378 : vector<1x32xf32>
    %cst_163 = arith.constant dense<0.000000e+00> : vector<1xf32>
    %380 = vector.multi_reduction <add>, %379, %cst_163 [1] : vector<1x32xf32> to vector<1xf32>
    %381 = vector.shape_cast %380 : vector<1xf32> to vector<1x1xf32>
    %c0_164 = arith.constant 0 : index
    %c0_165 = arith.constant 0 : index
    %382 = memref.load %arg21[%c0_164, %c0_165] : memref<1x1xf32, #tpu.memory_space<smem>>
    %383 = vector.broadcast %382 : f32 to vector<1x1xf32>
    %384 = arith.addf %381, %383 : vector<1x1xf32>
    %385 = arith.negf %384 : vector<1x1xf32>
    %386 = math.exp %385 : vector<1x1xf32>
    %cst_166 = arith.constant 1.000000e+00 : f32
    %387 = vector.broadcast %cst_166 : f32 to vector<1x1xf32>
    %388 = arith.addf %387, %386 : vector<1x1xf32>
    %389 = arith.divf %387, %388 : vector<1x1xf32>
    %390 = vector.shape_cast %389 : vector<1x1xf32> to vector<1x1x1xf32>
    %c0_167 = arith.constant 0 : index
    %c0_168 = arith.constant 0 : index
    %c0_169 = arith.constant 0 : index
    %391 = vector.load %arg22[%c0_167, %c0_168, %c0_169] : memref<1x1x1xf32, #tpu.memory_space<vmem>>, vector<1x1x1xf32>
    tpu.vector_store %arg22[%c0_167, %c0_168, %c0_169], %390 {strides = array<i32>} : memref<1x1x1xf32, #tpu.memory_space<vmem>>, vector<1x1x1xf32>,
    return
  }
  func.func @transform_0(%arg0: i32) -> (i32, i32, i32) {
    %c0_i32 = arith.constant 0 : i32
    %c0_i32_0 = arith.constant 0 : i32
    %c0_i32_1 = arith.constant 0 : i32
    return %arg0, %c0_i32, %c0_i32_0 : i32, i32, i32
  }
  func.func @transform_1(%arg0: i32) -> (i32, i32, i32) {
    %c0_i32 = arith.constant 0 : i32
    %c0_i32_0 = arith.constant 0 : i32
    %c0_i32_1 = arith.constant 0 : i32
    return %arg0, %c0_i32, %c0_i32_0 : i32, i32, i32
  }
  func.func @transform_2(%arg0: i32) -> (i32, i32) {
    %c0_i32 = arith.constant 0 : i32
    %c0_i32_0 = arith.constant 0 : i32
    %c0_i32_1 = arith.constant 0 : i32
    return %c0_i32, %c0_i32_0 : i32, i32
  }
  func.func @transform_3(%arg0: i32) -> (i32, i32) {
    %c0_i32 = arith.constant 0 : i32
    %c0_i32_0 = arith.constant 0 : i32
    %c0_i32_1 = arith.constant 0 : i32
    return %c0_i32, %c0_i32_0 : i32, i32
  }
  func.func @transform_4(%arg0: i32) -> (i32, i32) {
    %c0_i32 = arith.constant 0 : i32
    %c0_i32_0 = arith.constant 0 : i32
    %c0_i32_1 = arith.constant 0 : i32
    return %c0_i32, %c0_i32_0 : i32, i32
  }
  func.func @transform_5(%arg0: i32) -> (i32, i32, i32) {
    %c0_i32 = arith.constant 0 : i32
    %c0_i32_0 = arith.constant 0 : i32
    %c0_i32_1 = arith.constant 0 : i32
    %c0_i32_2 = arith.constant 0 : i32
    return %c0_i32, %c0_i32_0, %c0_i32_1 : i32, i32, i32
  }
  func.func @transform_6(%arg0: i32) -> (i32, i32, i32) {
    %c0_i32 = arith.constant 0 : i32
    %c0_i32_0 = arith.constant 0 : i32
    %c0_i32_1 = arith.constant 0 : i32
    %c0_i32_2 = arith.constant 0 : i32
    return %c0_i32, %c0_i32_0, %c0_i32_1 : i32, i32, i32
  }
  func.func @transform_7(%arg0: i32) -> (i32, i32, i32) {
    %c0_i32 = arith.constant 0 : i32
    %c0_i32_0 = arith.constant 0 : i32
    %c0_i32_1 = arith.constant 0 : i32
    %c0_i32_2 = arith.constant 0 : i32
    return %c0_i32, %c0_i32_0, %c0_i32_1 : i32, i32, i32
  }
  func.func @transform_8(%arg0: i32) -> (i32, i32, i32) {
    %c0_i32 = arith.constant 0 : i32
    %c0_i32_0 = arith.constant 0 : i32
    %c0_i32_1 = arith.constant 0 : i32
    %c0_i32_2 = arith.constant 0 : i32
    return %c0_i32, %c0_i32_0, %c0_i32_1 : i32, i32, i32
  }
  func.func @transform_9(%arg0: i32) -> (i32, i32, i32) {
    %c0_i32 = arith.constant 0 : i32
    %c0_i32_0 = arith.constant 0 : i32
    %c0_i32_1 = arith.constant 0 : i32
    %c0_i32_2 = arith.constant 0 : i32
    return %c0_i32, %c0_i32_0, %c0_i32_1 : i32, i32, i32
  }
  func.func @transform_10(%arg0: i32) -> (i32, i32, i32) {
    %c0_i32 = arith.constant 0 : i32
    %c0_i32_0 = arith.constant 0 : i32
    %c0_i32_1 = arith.constant 0 : i32
    %c0_i32_2 = arith.constant 0 : i32
    return %c0_i32, %c0_i32_0, %c0_i32_1 : i32, i32, i32
  }
  func.func @transform_11(%arg0: i32) -> (i32, i32, i32) {
    %c0_i32 = arith.constant 0 : i32
    %c0_i32_0 = arith.constant 0 : i32
    %c0_i32_1 = arith.constant 0 : i32
    %c0_i32_2 = arith.constant 0 : i32
    return %c0_i32, %c0_i32_0, %c0_i32_1 : i32, i32, i32
  }
  func.func @transform_12(%arg0: i32) -> (i32, i32, i32) {
    %c0_i32 = arith.constant 0 : i32
    %c0_i32_0 = arith.constant 0 : i32
    %c0_i32_1 = arith.constant 0 : i32
    %c0_i32_2 = arith.constant 0 : i32
    return %c0_i32, %c0_i32_0, %c0_i32_1 : i32, i32, i32
  }
  func.func @transform_13(%arg0: i32) -> (i32, i32, i32) {
    %c0_i32 = arith.constant 0 : i32
    %c0_i32_0 = arith.constant 0 : i32
    %c0_i32_1 = arith.constant 0 : i32
    %c0_i32_2 = arith.constant 0 : i32
    return %c0_i32, %c0_i32_0, %c0_i32_1 : i32, i32, i32
  }
  func.func @transform_14(%arg0: i32) -> (i32, i32, i32) {
    %c0_i32 = arith.constant 0 : i32
    %c0_i32_0 = arith.constant 0 : i32
    %c0_i32_1 = arith.constant 0 : i32
    %c0_i32_2 = arith.constant 0 : i32
    return %c0_i32, %c0_i32_0, %c0_i32_1 : i32, i32, i32
  }
  func.func @transform_15(%arg0: i32) -> (i32, i32, i32) {
    %c0_i32 = arith.constant 0 : i32
    %c0_i32_0 = arith.constant 0 : i32
    %c0_i32_1 = arith.constant 0 : i32
    %c0_i32_2 = arith.constant 0 : i32
    return %c0_i32, %c0_i32_0, %c0_i32_1 : i32, i32, i32
  }
  func.func @transform_16(%arg0: i32) -> (i32, i32, i32) {
    %c0_i32 = arith.constant 0 : i32
    %c0_i32_0 = arith.constant 0 : i32
    %c0_i32_1 = arith.constant 0 : i32
    %c0_i32_2 = arith.constant 0 : i32
    return %c0_i32, %c0_i32_0, %c0_i32_1 : i32, i32, i32
  }
  func.func @transform_17(%arg0: i32) -> (i32, i32) {
    %c0_i32 = arith.constant 0 : i32
    %c0_i32_0 = arith.constant 0 : i32
    %c0_i32_1 = arith.constant 0 : i32
    return %c0_i32, %c0_i32_0 : i32, i32
  }
  func.func @transform_18(%arg0: i32) -> (i32, i32) {
    %c0_i32 = arith.constant 0 : i32
    %c0_i32_0 = arith.constant 0 : i32
    %c0_i32_1 = arith.constant 0 : i32
    return %c0_i32, %c0_i32_0 : i32, i32
  }
  func.func @transform_19(%arg0: i32) -> (i32, i32) {
    %c0_i32 = arith.constant 0 : i32
    %c0_i32_0 = arith.constant 0 : i32
    %c0_i32_1 = arith.constant 0 : i32
    return %c0_i32, %c0_i32_0 : i32, i32
  }
  func.func @transform_20(%arg0: i32) -> (i32, i32) {
    %c0_i32 = arith.constant 0 : i32
    %c0_i32_0 = arith.constant 0 : i32
    %c0_i32_1 = arith.constant 0 : i32
    return %c0_i32, %c0_i32_0 : i32, i32
  }
  func.func @transform_21(%arg0: i32) -> (i32, i32, i32) {
    %c0_i32 = arith.constant 0 : i32
    %c0_i32_0 = arith.constant 0 : i32
    %c0_i32_1 = arith.constant 0 : i32
    return %arg0, %c0_i32, %c0_i32_0 : i32, i32, i32
  }
}

</mosaic_0001>

<bundles_post_ra>
// kernel: forward.1
= control target key start
LH: loop header
LB: loop body
LE: loop exit
PB: predicated region body
PF: predicated region fallthrough
CT: control target
= control target key end

     0   :  { %s3796_s0 = inlined_call_operand.vmem [shape: s32[2,8,1], index: 0, kind: input, shape index: {}]   ;;  %s3797_s1 = inlined_call_operand.vmem [shape: f32[2,8,103], index: 1, kind: input, shape index: {}]   ;;  %s3798_s2 = inlined_call_operand.vmem [shape: f32[8,32], index: 2, kind: input, shape index: {}]   ;;  %s3799_s3 = inlined_call_operand.vmem [shape: bf16[27,24], index: 3, kind: input, shape index: {}]   ;;  %s3800_s4 = inlined_call_operand.vmem [shape: bf16[97,2], index: 4, kind: input, shape index: {}]   ;;  %s3801_s5 = inlined_call_operand.vmem [shape: bf16[2,32,96], index: 5, kind: input, shape index: {}]   ;;  %s3802_s6 = inlined_call_operand.vmem [shape: f32[2,1,96], index: 6, kind: input, shape index: {}]   ;;  %s3803_s7 = inlined_call_operand.vmem [shape: bf16[2,32,32], index: 7, kind: input, shape index: {}]   ;;  %s3804_s8 = inlined_call_operand.vmem [shape: f32[2,1,32], index: 8, kind: input, shape index: {}]   ;;  %s3805_s9 = inlined_call_operand.vmem [shape: f32[2,1,32], index: 9, kind: input, shape index: {}]   ;;  %s3806_s10 = inlined_call_operand.vmem [shape: f32[2,1,32], index: 10, kind: input, shape index: {}]   ;;  %s3807_s11 = inlined_call_operand.vmem [shape: bf16[2,32,128], index: 11, kind: input, shape index: {}]   ;;  %s3808_s12 = inlined_call_operand.vmem [shape: f32[2,1,128], index: 12, kind: input, shape index: {}]   ;;  %s3809_s13 = inlined_call_operand.vmem [shape: bf16[2,128,32], index: 13, kind: input, shape index: {}]   ;;  %s3810_s14 = inlined_call_operand.vmem [shape: f32[2,1,32], index: 14, kind: input, shape index: {}]   ;;  %s3811_s15 = inlined_call_operand.vmem [shape: f32[2,1,32], index: 15, kind: input, shape index: {}]   ;;  %s3812_s16 = inlined_call_operand.vmem [shape: f32[2,1,32], index: 16, kind: input, shape index: {}]   ;;  %s3813_s17 = inlined_call_operand.vmem [shape: f32[1,32], index: 17, kind: input, shape index: {}]   ;;  %s3814_s18 = inlined_call_operand.vmem [shape: f32[1,32], index: 18, kind: input, shape index: {}]   ;;  %s3815_s19 = inlined_call_operand.<no memory space> [shape: f32[1,1], index: 19, kind: input, shape index: {}]   ;;  %s3816_s20 = inlined_call_operand.<no memory space> [shape: f32[1,1], index: 20, kind: input, shape index: {}]   ;;  %s3817_s21 = inlined_call_operand.vmem [shape: f32[2,1,1], index: 21, kind: output, shape index: {}]  }
   0x1   :  { %3831 = sst [smem:[#allocation4_spill]] %s3796_s0 }
   0x2   :  { %3832 = sst [smem:[#allocation5_spill]] %s3797_s1 }
   0x3   :  { %3833 = sst [smem:[#allocation6_spill]] %s3798_s2 }
   0x4   :  { %3834 = sst [smem:[#allocation7_spill]] %s3799_s3  ;;  %s3353_s3 = smov 0  }
   0x5   :  { %3835 = sst [smem:[#allocation8_spill]] %s3800_s4 }
   0x6   :  { %3836 = sst [smem:[#allocation9_spill]] %s3801_s5 }
   0x7   :  { %26 = sst [smem:[#allocation2]] %s3815_s19 }
   0x8   :  { %27 = sst [smem:[#allocation3]] %s3816_s20 }
   0x9 LB: > { %s2677_s28 = sadd.s32 4294967295, %s3215_s3   ;;  %p2681_p0 = scmp.ge.s32.totalorder %s3215_s3, 1  ;;  %s3215_s3 = sphi %s3353_s3, %s33_s3  }
   0xa   : > { %p597_p1 = scmp.lt.s32.totalorder %s3215_s3, 3 }
   0xc   : > { %p598_p2 = pnand %p2681_p0, %p597_p1 }
   0xd   : > { %v3217_v0 = vmov (!%p598_p2), 0   ;;  %p658_p3 = scmp.lt.s32.totalorder (!%p598_p2), %s2677_s28, 1  ;;  %v3218_v1 = vmov (!%p598_p2), 0.0   ;;  %s3837_s29 = sld [smem:[#allocation7_spill]] (!%p598_p2)  ;;  %vm699_vm0 = vcmask (!%p598_p2), 1044480   ;;  %vm700_vm1 = vcmask (!%p598_p2), 1045504  }
   0xe   : > { %601 = sbr.rel (%p598_p2) target bundleno = 6518 (0x1976), region = 104  ;;  %3119 = vset.pattern.permute.xlu0 (!%p598_p2), %v3217_v0  ;;  %2881 = vmatprep.subr.bf16.mxu1 (!%p598_p2), %v3218_v1  ;;  %v3219_v4 = vmov (!%p598_p2), 65535   ;;  %s3838_s23 = sld [smem:[#allocation4_spill]] (!%p598_p2)  ;;  %vm3220_vm2 = vmmov (!%p598_p2), 0   ;;  %v671_v11 = vlaneseq (!%p598_p2)  ;;  %vm695_vm4 = vcmask (!%p598_p2), 220160  }
   0xf   : > { %2915 = vmatprep.subr.bf16.mxu0 (!%p598_p2), %v3218_v1  ;;  %v701_v5 = vsel (!%p598_p2), %vm699_vm0, 4294967295, %v3219_v4  ;;  %s3839_s25 = sld [smem:[#allocation5_spill]] (!%p598_p2)  ;;  %2885 = vmatprep.mubr.msk.bf16.mxu1 (!%p598_p2), %vm3220_vm2, %v3218_v1  ;;  %s3221_s27 = smov (!%p598_p2), 122   ;;  %vm807_vm5 = vcmask (!%p598_p2), 1040384   ;;  %vm803_vm6 = vcmask (!%p598_p2), 793600   ;;  %vm861_vm7 = vcmask (!%p598_p2), 195584  }
  0x10   : > { %v702_v6 = vsel (!%p598_p2), %vm700_vm1, %v701_v5, 0  ;;  %2917 = vmatprep.mubr.msk.bf16.mxu0 (!%p598_p2), %vm3220_vm2, %v3218_v1  ;;  %s3827_s19 = smov (!%p598_p2), 24   ;;  %v672_v12 = vand.u32 (!%p598_p2), 127, %v671_v11  ;;  %s3840_s4 = sld [smem:[#allocation8_spill]] (!%p598_p2)  ;;  %v809_v23 = vsel (!%p598_p2), %vm807_vm5, 65535, %v3217_v0  ;;  %vm863_vm8 = vcmask (!%p598_p2), 244736  }
  0x11   : > { %s3841_s22 = sld [smem:[#allocation9_spill]] (!%p598_p2)  ;;  %s3223_s24 = smov (!%p598_p2), 30   ;;  %vm891_vm9 = vcmask (!%p598_p2), 261120   ;;  %v2696_v43 = vld [vmem:[%s3802_s6] ss:$0 sm:$0xff] (!%p598_p2)  ;;  %vm939_vm10 = vcmask (!%p598_p2), 64512  }
  0x12   : > { %s3224_s0 = smov (!%p598_p2), 88   ;;  %s3226_s5 = smov (!%p598_p2), 80   ;;  %vm1003_vm11 = vcmask (!%p598_p2), 1043456   ;;  %vm1390_vm12 = vcmask (!%p598_p2), 130048   ;;  %vm2603_vm14 = vcmask (!%p598_p2), 253952   ;;  %vm2616_vm15 = vcmask (!%p598_p2), 0  }
  0x13   : > { %v3121_v2 = vld [vmem:[%s3837_s29] sm:$0xff] (!%p598_p2)   ;;  %v3122_v3 = vld [vmem:[%s3837_s29 + $0x8] sm:$0x3f] (!%p598_p2)   ;;  %s3826_s2 = smov (!%p598_p2), 104   ;;  %s3821_s20 = smov (!%p598_p2), 48  }
  0x14   : > { %2882 = vmatpush3.bf16.msra.mxu1 (!%p598_p2), %v3121_v2  ;;  %v704_v9 = vand.u32 (!%p598_p2), %v3122_v3, %v702_v6 }
  0x15   : > { %s3854_s28 = smov (!%p658_p3, %s2677_s28), 1  ;;  %2883 = vmatprep.subr.bf16.mxu1 %v3218_v1 }
  0x16   : > { %s2682_s30 = sshll.u32 %s3854_s28, 3  ;;  %v3123_v15 = vld [vmem:[%s3840_s4] sm:$0xff]   ;;  %v3124_v17 = vld [vmem:[%s3840_s4 + $0x8] sm:$0xff]   ;;  %v3125_v18 = vld [vmem:[%s3840_s4 + $0x10] sm:$0xff]  }
  0x17   : > { %s661_s1 = scalar_lea.vmem %s3838_s23, %s2682_s30  ;;  %s665_s26 = scalar_lea.vmem %s3839_s25, %s2682_s30  ;;  %v3126_v19 = vld [vmem:[%s3840_s4 + $0x18] sm:$0xff]   ;;  %v3127_v20 = vld [vmem:[%s3840_s4 + $0x20] sm:$0xff]   ;;  %v3120_v21 = vld [vmem:[%s3840_s4 + $0x30] ss:$0 sps:$4 sm:$0x11]  }
  0x18   : > { %v670_v7 = vld [vmem:[%s661_s1] sm:$0xff]  ;;  %2884 = vmatpush3.bf16.msra.mxu1 %v704_v9  ;;  %v3128_v22 = vld [vmem:[%s3840_s4 + $0x28] sm:$0xff]   ;;  %v811_v24 = vand.u32 %v3120_v21, %v809_v23  ;;  %s3225_s30 = smov 96   ;;  %s3227_s23 = smov 120  }
  0x19   : > { %v746_v8 = vld [vmem:[%s665_s26] sm:$0xff]  ;;  %674 = vperm.xlu0 %3119, %v670_v7   ;;  %2889 = vmatprep.subr.bf16.mxu1 %v3218_v1  ;;  %v3130_v31 = vld [vmem:[%s3841_s22 + $0x8] sm:$0xff]   ;;  %s3842_s26 = sld [smem:[#allocation6_spill]]  ;;  %s3824_s1 = smov 72  }
  0x1a   : > { %v747_v10 = vpack.c.bf16 %v746_v8, %v746_v8  ;;  %854 = vrot.lane.b32.xlu1 %v746_v8, %s3827_s19  ;;  %v3129_v26 = vld [vmem:[%s3841_s22] sm:$0xff]   ;;  %s3823_s25 = smov 56  }
  0x1d   : > { %762 = vrot.lane.b32.xlu0 %v747_v10, %s3221_s27  ;;  %s3822_s27 = smov 40  }
  0x1f   : > { %v865_v37 = vld [vmem:[%s3842_s26] sm:$0xff]  ;;  %s3825_s26 = smov 64  }
  0x8c   : > { %v855_v36 = vpop.permute.xlu1 %854 }
  0x98   : > { %v675_v13 = vpop.permute.xlu0 %674 }
  0x99   : > { %vm676_vm3 = vcmp.eq.s32.totalorder %v675_v13, %v672_v12 }
  0x9a   : > { %v2684_v14 = vsel %vm676_vm3, 1.0, %v3218_v1 }
  0x9b   : > { %v679_v16 = vpack.c.bf16 %v2684_v14, %v2684_v14 }
  0x9c   : > { %v763_v25 = vpop.permute.xlu0 %762 }
  0x9d   : > { %2886 = vmatmul.mubr.msk.bf16.vlgmr.msra.gmra.mrb[0].mxu1 %vm695_vm4, %v679_v16 }
  0x9e   : > { %2890 = vmatpush3.bf16.msra.mxu1 %v3123_v15  ;;  %2903 = vmatprep.mubr.msk.bf16.mxu1 %vm3220_vm2, %v3218_v1 }
  0x9f   : > { %2891 = vmatprep.subr.bf16.mxu1 %v3218_v1 }
  0xa2   : > { %2892 = vmatpush3.bf16.msra.mxu1 %v3124_v17 }
  0xa3   : > { %2893 = vmatprep.subr.bf16.mxu1 %v3218_v1 }
  0xa6   : > { %2894 = vmatpush3.bf16.msra.mxu1 %v3125_v18 }
  0xa7   : > { %2895 = vmatprep.subr.bf16.mxu1 %v3218_v1 }
  0xaa   : > { %2896 = vmatpush3.bf16.msra.mxu1 %v3126_v19 }
  0xab   : > { %2897 = vmatprep.subr.bf16.mxu1 %v3218_v1 }
  0xae   : > { %2898 = vmatpush3.bf16.msra.mxu1 %v3127_v20 }
  0xaf   : > { %2899 = vmatprep.subr.bf16.mxu1 %v3218_v1 }
  0xb2   : > { %2900 = vmatpush3.bf16.msra.mxu1 %v3128_v22 }
  0xb3   : > { %2901 = vmatprep.subr.bf16.mxu1 %v3218_v1 }
  0xb6   : > { %2902 = vmatpush3.bf16.msra.mxu1 %v811_v24 }
  0xb7   : > { %2907 = vmatprep.subr.bf16.mxu1 %v3218_v1 }
  0xb9   : > { %2904 = vmatmul.mubr.msk.bf16.vlgmr.msra.gmra.mrb[4].mxu1 %vm803_vm6, %v763_v25 }
  0xba   : > { %2911 = vmatprep.mubr.msk.bf16.mxu1 %vm3220_vm2, %v3218_v1  ;;  %2908 = vmatpush3.bf16.msra.mxu1 %v3129_v26 }
  0xbb   : > { %2909 = vmatprep.subr.bf16.mxu1 %v3218_v1 }
  0xbe   : > { %2910 = vmatpush3.bf16.msra.mxu1 %v3130_v31 }
  0xbf   : > { %2927 = vmatprep.subr.bf16.mxu1 %v3218_v1 }
 0x170   : > { %v740_v27 = vpop.f32.mrb[0].mxu1 }
 0x171   : > { %v2887_v28 = vpop.f32.mrb[1].mxu1  ;;  %v862_v38 = vsel %vm861_vm7, %v740_v27, %v855_v36 }
 0x172   : > { %v743_v29 = vpop.f32.mrb[2].mxu1 }
 0x173   : > { %v2888_v30 = vpop.f32.mrb[3].mxu1 }
 0x18c   : > { %v847_v32 = vpop.f32.mrb[4].mxu1 }
 0x18d   : > { %858 = vrot.lane.b32.xlu1 %v847_v32, %s3223_s24  ;;  %v2905_v33 = vpop.f32.mrb[5].mxu1  ;;  %s3830_s24 = smov 112  }
 0x18e   : > { %v850_v34 = vpop.f32.mrb[6].mxu1 }
 0x18f   : > { %v2906_v35 = vpop.f32.mrb[7].mxu1 }
 0x1ff   : > { %v859_v39 = vpop.permute.xlu1 %858 }
 0x200   : > { %v3430_v40 = vsel %vm863_vm8, %v862_v38, %v859_v39 }
 0x201   : > { %v3433_v41 = vadd.f32 %v865_v37, %v3430_v40 }
 0x203   : > { %v867_v42 = vpack.c.bf16 %v3433_v41, %v3433_v41 }
 0x205   : > { %2912 = vmatmul.mubr.msk.bf16.vlgmr.msra.gmra.mrb[8].mxu1 %vm891_vm9, %v867_v42 }
 0x206   : > { %2929 = vmatprep.mubr.msk.bf16.mxu1 %vm3220_vm2, %v3218_v1 }
 0x2d8   : > { %v929_v44 = vpop.f32.mrb[8].mxu1 }
 0x2d9   : > { %v930_v45 = vadd.f32 %v2696_v43, %v929_v44  ;;  %v2913_v46 = vpop.f32.mrb[9].mxu1 }
 0x2da   : > { %v932_v47 = vpop.f32.mrb[10].mxu1 }
 0x2db   : > { %v3443_v48 = vpack.c.bf16 %v930_v45, %v930_v45  ;;  %v2914_v49 = vpop.f32.mrb[11].mxu1 }
 0x2dd   : > { %1049 = vrot.lane.b32.xlu1 %v3443_v48, %s3224_s0  ;;  %937 = vrot.lane.b32.xlu0 %v3443_v48, %s3225_s30 }
 0x2e1   : > { %1159 = vrot.lane.b32.xlu1 %v3443_v48, %s3226_s5  ;;  %1047 = vrot.lane.b32.xlu0 %v3443_v48, %s3227_s23 }
 0x2e5   : > { %1269 = vrot.lane.b32.xlu1 %v3443_v48, %s3824_s1  ;;  %1157 = vrot.lane.b32.xlu0 %v3443_v48, %s3830_s24  ;;  %s3844_s24 = smov 104   ;;  %s3849_s1 = smov 48  }
 0x2e9   : > { %1267 = vrot.lane.b32.xlu0 %v3443_v48, %s3826_s2  ;;  %s3828_s2 = smov 16  }
 0x34f   : > { %v1050_v50 = vpop.permute.xlu1 %1049  ;;  %v938_v51 = vpop.permute.xlu0 %937 }
 0x350   : > { %v1055_v52 = vsel %vm939_vm10, %v1050_v50, 0  ;;  %v944_v53 = vsel %vm939_vm10, %v938_v51, 0 }
 0x351   : > { %2916 = vmatpush3.bf16.xpose.msra.mxu0 %v944_v53  ;;  %2928 = vmatpush3.bf16.xpose.msra.mxu1 %v1055_v52 }
 0x352   : > { %2939 = vmatprep.subr.bf16.mxu1 %v3218_v1  ;;  %2921 = vmatprep.subr.bf16.mxu0 %v3218_v1 }
 0x353   : > { %v1160_v54 = vpop.permute.xlu1 %1159  ;;  %v1048_v55 = vpop.permute.xlu0 %1047 }
 0x354   : > { %v1165_v56 = vsel %vm939_vm10, %v1160_v54, 0 }
 0x357   : > { %v1270_v57 = vpop.permute.xlu1 %1269  ;;  %v1158_v58 = vpop.permute.xlu0 %1157 }
 0x358   : > { %2918 = vmatmul.mubr.msk.bf16.vlgmr.msra.gmra.mrb[0].mxu0 %vm939_vm10, %v3443_v48  ;;  %2930 = vmatmul.mubr.msk.bf16.vlgmr.msra.gmra.mrb[12].mxu1 %vm939_vm10, %v1048_v55  ;;  %v1275_v59 = vsel %vm939_vm10, %v1270_v57, 0 }
 0x359   : > { %2940 = vmatpush3.bf16.xpose.msra.mxu1 %v1165_v56  ;;  %2941 = vmatprep.mubr.msk.bf16.mxu1 %vm3220_vm2, %v3218_v1 }
 0x35a   : > { %2951 = vmatprep.subr.bf16.mxu1 %v3218_v1  ;;  %2923 = vmatprep.mubr.msk.bf16.mxu0 %vm3220_vm2, %v3218_v1 }
 0x35b   : > { %v1268_v60 = vpop.permute.xlu0 %1267 }
 0x360   : > { %2942 = vmatmul.mubr.msk.bf16.vlgmr.msra.gmra.mrb[16].mxu1 %vm939_vm10, %v1158_v58 }
 0x361   : > { %2952 = vmatpush3.bf16.xpose.msra.mxu1 %v1275_v59  ;;  %2953 = vmatprep.mubr.msk.bf16.mxu1 %vm3220_vm2, %v3218_v1 }
 0x362   : > { %2963 = vmatprep.subr.bf16.mxu1 %v3218_v1 }
 0x368   : > { %2954 = vmatmul.mubr.msk.bf16.vlgmr.msra.gmra.mrb[20].mxu1 %vm939_vm10, %v1268_v60 }
 0x369   : > { %2967 = vmatprep.mubr.msk.bf16.mxu1 %vm3220_vm2, %v3218_v1 }
 0x42b   : > { %v980_v61 = vpop.f32.mrb[0].mxu0  ;;  %v1091_v62 = vpop.f32.mrb[12].mxu1 }
 0x42c   : > { %v2919_v63 = vpop.f32.mrb[1].mxu0  ;;  %v2931_v0 = vpop.f32.mrb[13].mxu1  ;;  %v986_v2 = vsel %vm939_vm10, %v980_v61, -inf  ;;  %v1097_v3 = vsel %vm939_vm10, %v1091_v62, -inf }
 0x42d   : > { %987 = vmax.xlane.f32.xlu1 %v986_v2  ;;  %v983_v4 = vpop.f32.mrb[2].mxu0  ;;  %1098 = vmax.xlane.f32.xlu0 %v1097_v3  ;;  %v1094_v5 = vpop.f32.mrb[14].mxu1 }
 0x42e   : > { %v2920_v6 = vpop.f32.mrb[3].mxu0  ;;  %v2932_v7 = vpop.f32.mrb[15].mxu1 }
 0x433   : > { %v1201_v8 = vpop.f32.mrb[16].mxu1 }
 0x434   : > { %v2943_v9 = vpop.f32.mrb[17].mxu1  ;;  %v1207_v10 = vsel %vm939_vm10, %v1201_v8, -inf }
 0x435   : > { %1208 = vmax.xlane.f32.xlu0 %v1207_v10  ;;  %v1204_v11 = vpop.f32.mrb[18].mxu1  ;;  %v3131_v9 = vld [vmem:[%s3803_s7] sm:$0xff]   ;;  %v3132_v10 = vld [vmem:[%s3803_s7 + $0x8] sm:$0xff]  }
 0x436   : > { %v2944_v12 = vpop.f32.mrb[19].mxu1  ;;  %2964 = vmatpush3.bf16.msra.mxu1 %v3131_v9 }
 0x437   : > { %2965 = vmatprep.subr.bf16.mxu1 %v3218_v1 }
 0x43a   : > { %2966 = vmatpush3.bf16.msra.mxu1 %v3132_v10 }
 0x43b   : > { %v1311_v13 = vpop.f32.mrb[20].mxu1  ;;  %2979 = vmatprep.subr.bf16.mxu1 %v3218_v1 }
 0x43c   : > { %v2955_v14 = vpop.f32.mrb[21].mxu1  ;;  %v1317_v15 = vsel %vm939_vm10, %v1311_v13, -inf }
 0x43d   : > { %1318 = vmax.xlane.f32.xlu1 %v1317_v15  ;;  %v1314_v16 = vpop.f32.mrb[22].mxu1 }
 0x43e   : > { %v2956_v17 = vpop.f32.mrb[23].mxu1 }
 0x4ba   : > { %v988_v18 = vpop.xlane.xlu1 %987  ;;  %v1099_v19 = vpop.xlane.xlu0 %1098 }
 0x4bb   : > { %v989_v20 = vsub.f32 %v980_v61, %v988_v18  ;;  %v1100_v21 = vsub.f32 %v1091_v62, %v1099_v19 }
 0x4bd   : > { %v990_v22 = vmul.f32 1.442695, %v989_v20  ;;  %v1101_v23 = vmul.f32 1.442695, %v1100_v21 }
 0x4bf   : > { %3157 = vpow2.f32 %v990_v22 }
 0x4c0   : > { %3159 = vpow2.f32 %v1101_v23 }
 0x4c2   : > { %v1209_v24 = vpop.xlane.xlu0 %1208 }
 0x4c3   : > { %v1210_v25 = vsub.f32 %v1201_v8, %v1209_v24 }
 0x4c5   : > { %v1211_v26 = vmul.f32 1.442695, %v1210_v25 }
 0x4c7   : > { %3161 = vpow2.f32 %v1211_v26  ;;  %v2708_v26 = vld [vmem:[%s3804_s8] ss:$0 sm:$0xff] }
 0x4c9   : > { %v3158_v27 = vpop.eup %3157 }
 0x4ca   : > { %v3160_v28 = vpop.eup %3159  ;;  %v992_v29 = vsel %vm939_vm10, %v3158_v27, 0.0  ;;  %v1319_v33 = vpop.xlane.xlu1 %1318 }
 0x4cb   : > { %993 = vadd.xlane.f32.xlu0 %v992_v29  ;;  %v1103_v30 = vsel %vm939_vm10, %v3160_v28, 0.0  ;;  %v1320_v34 = vsub.f32 %v1311_v13, %v1319_v33 }
 0x4cc   : > { %1104 = vadd.xlane.f32.xlu1 %v1103_v30 }
 0x4cd   : > { %v1321_v35 = vmul.f32 1.442695, %v1320_v34 }
 0x4cf   : > { %3163 = vpow2.f32 %v1321_v35 }
 0x4d1   : > { %v3162_v31 = vpop.eup %3161 }
 0x4d2   : > { %v1213_v32 = vsel %vm939_vm10, %v3162_v31, 0.0 }
 0x4d3   : > { %1214 = vadd.xlane.f32.xlu0 %v1213_v32 }
 0x4d9   : > { %v3164_v36 = vpop.eup %3163 }
 0x4da   : > { %v1323_v37 = vsel %vm939_vm10, %v3164_v36, 0.0 }
 0x4dd   : > { %1109 = vrot.lane.b32.xlu1 %v3443_v48, %s3823_s25 }
 0x4e9   : > { %998 = vrot.lane.b32.xlu0 %v3443_v48, %s3825_s26 }
 0x4ed   : > { %1329 = vrot.lane.b32.xlu0 %v3443_v48, %s3822_s27 }
 0x501   : > { %1324 = vadd.xlane.f32.xlu1 %v1323_v37 }
 0x512   : > { %1219 = vrot.lane.b32.xlu1 %v3443_v48, %s3821_s20  ;;  %s3829_s20 = smov 8  }
 0x558   : > { %v994_v38 = vpop.xlane.xlu0 %993 }
 0x559   : > { %3165 = vrcp.f32 %v994_v38  ;;  %v1105_v39 = vpop.xlane.xlu1 %1104 }
 0x55a   : > { %3167 = vrcp.f32 %v1105_v39  ;;  %v3133_v39 = vld [vmem:[%s3807_s11] sm:$0xff]  }
 0x55d   : > { %v1110_v47 = vpop.permute.xlu1 %1109 }
 0x55e   : > { %v1115_v51 = vsel %vm1003_vm11, %v1110_v47, 0 }
 0x560   : > { %v1215_v42 = vpop.xlane.xlu0 %1214 }
 0x561   : > { %3169 = vrcp.f32 %v1215_v42 }
 0x563   : > { %v3166_v43 = vpop.eup %3165 }
 0x564   : > { %v996_v44 = vmul.f32 %v3166_v43, %v3158_v27  ;;  %v999_v45 = vpop.permute.xlu0 %998  ;;  %v3168_v50 = vpop.eup %3167 }
 0x565   : > { %v1005_v46 = vsel %vm1003_vm11, %v999_v45, 0  ;;  %v1107_v48 = vmul.f32 %v3168_v50, %v3160_v28 }
 0x566   : > { %2922 = vmatpush3.bf16.msra.mxu0 %v1005_v46  ;;  %v997_v49 = vpack.c.bf16 %v996_v44, %v996_v44  ;;  %v2712_v46 = vld [vmem:[%s3805_s9] ss:$0 sm:$0xff] }
 0x567   : > { %2933 = vmatprep.subr.bf16.mxu0 %v3218_v1  ;;  %v1108_v52 = vpack.c.bf16 %v1107_v48, %v1107_v48 }
 0x568   : > { %v1330_v58 = vpop.permute.xlu0 %1329 }
 0x569   : > { %2924 = vmatmul.mubr.msk.bf16.vlgmr.msra.gmra.mrb[4].mxu0 %vm939_vm10, %v997_v49  ;;  %v1335_v60 = vsel %vm1003_vm11, %v1330_v58, 0  ;;  %v2713_v49 = vld [vmem:[%s3806_s10] ss:$0 sm:$0xff]  ;;  %v3141_v58 = vld [vmem:[%s3809_s13 + $0x30] sm:$0xff]  }
 0x56a   : > { %2934 = vmatpush3.bf16.msra.mxu0 %v1115_v51  ;;  %2935 = vmatprep.mubr.msk.bf16.mxu0 %vm3220_vm2, %v3218_v1 }
 0x56b   : > { %2945 = vmatprep.subr.bf16.mxu0 %v3218_v1  ;;  %v3170_v53 = vpop.eup %3169 }
 0x56c   : > { %v1217_v55 = vmul.f32 %v3170_v53, %v3162_v31  ;;  %v3136_v53 = vld [vmem:[%s3809_s13 + $0x8] sm:$0xff]  }
 0x56e   : > { %v1218_v59 = vpack.c.bf16 %v1217_v55, %v1217_v55  ;;  %v3138_v55 = vld [vmem:[%s3809_s13 + $0x18] sm:$0xff]  }
 0x571   : > { %2936 = vmatmul.mubr.msk.bf16.vlgmr.msra.gmra.mrb[8].mxu0 %vm939_vm10, %v1108_v52  ;;  %v3135_v52 = vld [vmem:[%s3809_s13] sm:$0xff]  }
 0x572   : > { %2947 = vmatprep.mubr.msk.bf16.mxu0 %vm3220_vm2, %v3218_v1 }
 0x58e   : > { %v1325_v54 = vpop.xlane.xlu1 %1324 }
 0x58f   : > { %3171 = vrcp.f32 %v1325_v54  ;;  %v3137_v54 = vld [vmem:[%s3809_s13 + $0x10] sm:$0xff]  }
 0x592   : > { %v1220_v56 = vpop.permute.xlu1 %1219 }
 0x593   : > { %v1225_v57 = vsel %vm1003_vm11, %v1220_v56, 0  ;;  %v3139_v56 = vld [vmem:[%s3809_s13 + $0x20] sm:$0xff]  }
 0x594   : > { %2946 = vmatpush3.bf16.msra.mxu0 %v1225_v57  ;;  %v3140_v57 = vld [vmem:[%s3809_s13 + $0x28] sm:$0xff]  }
 0x595   : > { %2957 = vmatprep.subr.bf16.mxu0 %v3218_v1 }
 0x597   : > { %2948 = vmatmul.mubr.msk.bf16.vlgmr.msra.gmra.mrb[12].mxu0 %vm939_vm10, %v1218_v59  ;;  %v3142_v59 = vld [vmem:[%s3809_s13 + $0x38] sm:$0xff]  }
 0x598   : > { %2958 = vmatpush3.bf16.msra.mxu0 %v1335_v60  ;;  %2959 = vmatprep.mubr.msk.bf16.mxu0 %vm3220_vm2, %v3218_v1  ;;  %v2714_v60 = vld [vmem:[%s3808_s12] ss:$0 sm:$0xff] }
 0x599   : > { %v3172_v61 = vpop.eup %3171  ;;  %2971 = vmatprep.subr.bf16.mxu0 %v3218_v1 }
 0x59a   : > { %v1327_v62 = vmul.f32 %v3172_v61, %v3164_v36 }
 0x59c   : > { %v1328_v63 = vpack.c.bf16 %v1327_v62, %v1327_v62 }
 0x59f   : > { %2960 = vmatmul.mubr.msk.bf16.vlgmr.msra.gmra.mrb[16].mxu0 %vm939_vm10, %v1328_v63 }
 0x5a0   : > { %2975 = vmatprep.mubr.msk.bf16.mxu0 %vm3220_vm2, %v3218_v1  ;;  %2972 = vmatpush3.bf16.msra.mxu0 %v3133_v39 }
 0x5a1   : > { %2973 = vmatprep.subr.bf16.mxu0 %v3218_v1 }
 0x63c   : > { %v1041_v0 = vpop.f32.mrb[4].mxu0 }
 0x63d   : > { %v2925_v2 = vpop.f32.mrb[5].mxu0 }
 0x63e   : > { %v1044_v3 = vpop.f32.mrb[6].mxu0 }
 0x63f   : > { %v2926_v4 = vpop.f32.mrb[7].mxu0 }
 0x644   : > { %v1151_v5 = vpop.f32.mrb[8].mxu0 }
 0x645   : > { %1378 = vrot.lane.b32.xlu1 %v1151_v5, %s3829_s20  ;;  %v2937_v6 = vpop.f32.mrb[9].mxu0  ;;  %s3843_s20 = smov 112  }
 0x646   : > { %v1154_v7 = vpop.f32.mrb[10].mxu0 }
 0x647   : > { %v2938_v8 = vpop.f32.mrb[11].mxu0 }
 0x66a   : > { %v1261_v11 = vpop.f32.mrb[12].mxu0 }
 0x66b   : > { %1382 = vrot.lane.b32.xlu0 %v1261_v11, %s3828_s2  ;;  %v2949_v12 = vpop.f32.mrb[13].mxu0  ;;  %s3850_s2 = smov 8  }
 0x66c   : > { %v1264_v13 = vpop.f32.mrb[14].mxu0 }
 0x66d   : > { %v2950_v14 = vpop.f32.mrb[15].mxu0  ;;  %v2718_v13 = vld [vmem:[%s3810_s14] ss:$0 sm:$0xff] }
 0x672   : > { %v1371_v15 = vpop.f32.mrb[16].mxu0 }
 0x673   : > { %1386 = vrot.lane.b32.xlu1 %v1371_v15, %s3827_s19  ;;  %v2961_v16 = vpop.f32.mrb[17].mxu0  ;;  %s668_s19 = scalar_lea.vmem %s3817_s21, %s3854_s28 }
 0x674   : > { %v1374_v17 = vpop.f32.mrb[18].mxu0 }
 0x675   : > { %v2962_v18 = vpop.f32.mrb[19].mxu0 }
 0x6b7   : > { %v1379_v19 = vpop.permute.xlu1 %1378 }
 0x6b8   : > { %v1389_v21 = vsel %vm939_vm10, %v1041_v0, %v1379_v19 }
 0x6dd   : > { %v1383_v20 = vpop.permute.xlu0 %1382 }
 0x6de   : > { %v1391_v22 = vsel %vm1390_vm12, %v1389_v21, %v1383_v20 }
 0x6e5   : > { %v1387_v23 = vpop.permute.xlu1 %1386 }
 0x6e6   : > { %v1392_v24 = vsel %vm861_vm7, %v1391_v22, %v1387_v23 }
 0x6e7   : > { %v1393_v25 = vpack.c.bf16 %v1392_v24, %v1392_v24 }
 0x6e9   : > { %2968 = vmatmul.mubr.msk.bf16.vlgmr.msra.gmra.mrb[24].mxu1 %vm891_vm9, %v1393_v25 }
 0x6ea   : > { %2995 = vmatprep.mubr.msk.bf16.mxu1 %vm3220_vm2, %v3218_v1  ;;  %2980 = vmatpush3.bf16.msra.mxu1 %v3135_v52 }
 0x6eb   : > { %2981 = vmatprep.subr.bf16.mxu1 %v3218_v1 }
 0x6ee   : > { %2982 = vmatpush3.bf16.msra.mxu1 %v3136_v53 }
 0x6ef   : > { %2983 = vmatprep.subr.bf16.mxu1 %v3218_v1 }
 0x6f2   : > { %2984 = vmatpush3.bf16.msra.mxu1 %v3137_v54 }
 0x6f3   : > { %2985 = vmatprep.subr.bf16.mxu1 %v3218_v1 }
 0x6f6   : > { %2986 = vmatpush3.bf16.msra.mxu1 %v3138_v55 }
 0x6f7   : > { %2987 = vmatprep.subr.bf16.mxu1 %v3218_v1 }
 0x6fa   : > { %2988 = vmatpush3.bf16.msra.mxu1 %v3139_v56 }
 0x6fb   : > { %2989 = vmatprep.subr.bf16.mxu1 %v3218_v1 }
 0x6fe   : > { %2990 = vmatpush3.bf16.msra.mxu1 %v3140_v57 }
 0x6ff   : > { %2991 = vmatprep.subr.bf16.mxu1 %v3218_v1 }
 0x702   : > { %2992 = vmatpush3.bf16.msra.mxu1 %v3141_v58 }
 0x703   : > { %2993 = vmatprep.subr.bf16.mxu1 %v3218_v1 }
 0x706   : > { %2994 = vmatpush3.bf16.msra.mxu1 %v3142_v59 }
 0x707   : > { %3025 = vmatprep.subr.bf16.mxu1 %v3218_v1 }
 0x7bc   : > { %v1454_v27 = vpop.f32.mrb[24].mxu1 }
 0x7bd   : > { %v1455_v28 = vadd.f32 %v2708_v26, %v1454_v27  ;;  %v2969_v29 = vpop.f32.mrb[25].mxu1  ;;  %v3143_v26 = vld [vmem:[%s3841_s22 + $0x10] sm:$0xff]   ;;  %v3144_v27 = vld [vmem:[%s3841_s22 + $0x18] sm:$0xff]  }
 0x7be   : > { %v1457_v30 = vpop.f32.mrb[26].mxu1 }
 0x7bf   : > { %v2970_v31 = vpop.f32.mrb[27].mxu1  ;;  %v1460_v32 = vadd.f32 %v1455_v28, %v3433_v41  ;;  %v3134_v41 = vld [vmem:[%s3807_s11 + $0x8] sm:$0xff]  }
 0x7c0   : > { %2974 = vmatpush3.bf16.msra.mxu0 %v3134_v41 }
 0x7c1   : > { %v1463_v33 = vsel %vm891_vm9, %v1460_v32, 0.0  ;;  %2999 = vmatprep.subr.bf16.mxu0 %v3218_v1 }
 0x7c2   : > { %1464 = vadd.xlane.f32.xlu0 %v1463_v33 }
 0x84f   : > { %v1465_v34 = vpop.xlane.xlu0 %1464 }
 0x850   : > { %v1467_v35 = vmul.f32 0.03125, %v1465_v34  ;;  %v2728_v34 = vld [vmem:[%s3812_s16] ss:$0 sm:$0xff] }
 0x852   : > { %v1468_v36 = vsub.f32 %v1460_v32, %v1467_v35  ;;  %v2727_v32 = vld [vmem:[%s3811_s15] ss:$0 sm:$0xff] }
 0x854   : > { %v1469_v37 = vmul.f32 %v1468_v36, %v1468_v36 }
 0x856   : > { %v1470_v38 = vsel %vm891_vm9, %v1469_v37, 0.0 }
 0x857   : > { %1471 = vadd.xlane.f32.xlu1 %v1470_v38  ;;  %v2734_v38 = vld [vmem:[%s3802_s6 + $0x1] ss:$0 sm:$0xff] }
 0x8e4   : > { %v1472_v42 = vpop.xlane.xlu1 %1471 }
 0x8e5   : > { %v1473_v43 = vmul.f32 0.03125, %v1472_v42 }
 0x8e7   : > { %v1474_v44 = vadd.f32 1e-12, %v1473_v43 }
 0x8e9   : > { %3173 = vrsqrt.f32 %v1474_v44 }
 0x8f3   : > { %v3174_v45 = vpop.eup %3173 }
 0x8f4   : > { %v1476_v47 = vmul.f32 %v3174_v45, %v1468_v36 }
 0x8f6   : > { %v1483_v50 = vmul.f32 %v2712_v46, %v1476_v47 }
 0x8f8   : > { %v1490_v51 = vadd.f32 %v2713_v49, %v1483_v50 }
 0x8fa   : > { %v1491_v48 = vpack.c.bf16 %v1490_v51, %v1490_v51 }
 0x8fc   : > { %2976 = vmatmul.mubr.msk.bf16.vlgmr.msra.gmra.mrb[20].mxu0 %vm891_vm9, %v1491_v48 }
 0x8fd   : > { %3003 = vmatprep.mubr.msk.bf16.mxu0 %vm3220_vm2, %v3218_v1  ;;  %3000 = vmatpush3.bf16.msra.mxu0 %v3143_v26 }
 0x8fe   : > { %3001 = vmatprep.subr.bf16.mxu0 %v3218_v1 }
 0x901   : > { %3002 = vmatpush3.bf16.msra.mxu0 %v3144_v27 }
 0x902   : > { %3007 = vmatprep.subr.bf16.mxu0 %v3218_v1 }
 0x9cf   : > { %v1552_v61 = vpop.f32.mrb[20].mxu0 }
 0x9d0   : > { %v1553_v62 = vadd.f32 %v2714_v60, %v1552_v61  ;;  %v2977_v63 = vpop.f32.mrb[21].mxu0 }
 0x9d1   : > { %v1555_v0 = vpop.f32.mrb[22].mxu0 }
 0x9d2   : > { %v1558_v2 = vmul.f32 %v1553_v62, %v1553_v62  ;;  %v2978_v3 = vpop.f32.mrb[23].mxu0 }
 0x9d4   : > { %v1559_v4 = vmul.f32 %v1558_v2, %v1553_v62 }
 0x9d6   : > { %v1560_v5 = vmul.f32 0.044715, %v1559_v4 }
 0x9d8   : > { %v1561_v6 = vadd.f32 %v1560_v5, %v1553_v62 }
 0x9da   : > { %v1562_v7 = vmul.f32 0.7978846, %v1561_v6 }
 0x9dc   : > { %3175 = vtanh.f32 %v1562_v7 }
 0x9e6   : > { %v3176_v8 = vpop.eup %3175 }
 0x9e7   : > { %v1564_v9 = vadd.f32 1.0, %v3176_v8 }
 0x9e9   : > { %v1565_v10 = vmul.f32 0.5, %v1564_v9 }
 0x9eb   : > { %v1566_v11 = vmul.f32 %v1565_v10, %v1553_v62 }
 0x9ed   : > { %v1567_v12 = vpack.c.bf16 %v1566_v11, %v1566_v11 }
 0x9ef   : > { %2996 = vmatmul.mubr.bf16.vlgmr.msra.gmra.mrb[28].mxu1 %v1567_v12 }
 0x9f0   : > { %3027 = vmatprep.mubr.msk.bf16.mxu1 %vm3220_vm2, %v3218_v1 }
 0xac2   : > { %v1673_v14 = vpop.f32.mrb[28].mxu1 }
 0xac3   : > { %v1674_v15 = vadd.f32 %v2718_v13, %v1673_v14  ;;  %v2997_v16 = vpop.f32.mrb[29].mxu1 }
 0xac4   : > { %v1676_v17 = vpop.f32.mrb[30].mxu1 }
 0xac5   : > { %v2998_v18 = vpop.f32.mrb[31].mxu1  ;;  %v1679_v19 = vadd.f32 %v1674_v15, %v1490_v51 }
 0xac7   : > { %v1682_v20 = vsel %vm891_vm9, %v1679_v19, 0.0 }
 0xac8   : > { %1683 = vadd.xlane.f32.xlu0 %v1682_v20 }
 0xb55   : > { %v1684_v21 = vpop.xlane.xlu0 %1683 }
 0xb56   : > { %v1685_v22 = vmul.f32 0.03125, %v1684_v21 }
 0xb58   : > { %v1686_v23 = vsub.f32 %v1679_v19, %v1685_v22 }
 0xb5a   : > { %v1687_v24 = vmul.f32 %v1686_v23, %v1686_v23 }
 0xb5c   : > { %v1688_v25 = vsel %vm891_vm9, %v1687_v24, 0.0 }
 0xb5d   : > { %1689 = vadd.xlane.f32.xlu0 %v1688_v25 }
 0xbea   : > { %v1690_v28 = vpop.xlane.xlu0 %1689 }
 0xbeb   : > { %v1691_v29 = vmul.f32 0.03125, %v1690_v28 }
 0xbed   : > { %v1692_v30 = vadd.f32 1e-12, %v1691_v29 }
 0xbef   : > { %3177 = vrsqrt.f32 %v1692_v30 }
 0xbf9   : > { %v3178_v31 = vpop.eup %3177 }
 0xbfa   : > { %v1694_v33 = vmul.f32 %v3178_v31, %v1686_v23 }
 0xbfc   : > { %v1701_v35 = vmul.f32 %v2727_v32, %v1694_v33 }
 0xbfe   : > { %v3612_v36 = vadd.f32 %v2728_v34, %v1701_v35 }
 0xc00   : > { %v1709_v37 = vpack.c.bf16 %v3612_v36, %v3612_v36 }
 0xc02   : > { %3004 = vmatmul.mubr.msk.bf16.vlgmr.msra.gmra.mrb[24].mxu0 %vm891_vm9, %v1709_v37 }
 0xc03   : > { %3009 = vmatprep.mubr.msk.bf16.mxu0 %vm3220_vm2, %v3218_v1 }
 0xcd5   : > { %v1772_v39 = vpop.f32.mrb[24].mxu0 }
 0xcd6   : > { %v1773_v41 = vadd.f32 %v2734_v38, %v1772_v39  ;;  %v3005_v42 = vpop.f32.mrb[25].mxu0 }
 0xcd7   : > { %v1775_v43 = vpop.f32.mrb[26].mxu0 }
 0xcd8   : > { %v3622_v44 = vpack.c.bf16 %v1773_v41, %v1773_v41  ;;  %v3006_v45 = vpop.f32.mrb[27].mxu0 }
 0xcda   : > { %1780 = vrot.lane.b32.xlu1 %v3622_v44, %s3225_s30  ;;  %s3846_s30 = smov 72  }
 0xcde   : > { %1890 = vrot.lane.b32.xlu1 %v3622_v44, %s3224_s0  ;;  %s3845_s0 = smov 64  }
 0xce2   : > { %1888 = vrot.lane.b32.xlu1 %v3622_v44, %s3227_s23  ;;  %s3848_s23 = smov 40  }
 0xce6   : > { %2000 = vrot.lane.b32.xlu1 %v3622_v44, %s3226_s5  ;;  %s3847_s5 = smov 56  }
 0xcea   : > { %1998 = vrot.lane.b32.xlu1 %v3622_v44, %s3843_s20  ;;  %s3851_s20 = smov 16  }
 0xcee   : > { %2108 = vrot.lane.b32.xlu1 %v3622_v44, %s3844_s24  ;;  %s3852_s24 = smov 24  }
 0xd4c   : > { %v1781_v46 = vpop.permute.xlu1 %1780 }
 0xd4d   : > { %v1786_v47 = vsel %vm939_vm10, %v1781_v46, 0 }
 0xd4e   : > { %3008 = vmatpush3.bf16.xpose.msra.mxu0 %v1786_v47 }
 0xd4f   : > { %3013 = vmatprep.subr.bf16.mxu0 %v3218_v1 }
 0xd50   : > { %v1891_v61 = vpop.permute.xlu1 %1890 }
 0xd51   : > { %v1896_v3 = vsel %vm939_vm10, %v1891_v61, 0 }
 0xd54   : > { %v1889_v2 = vpop.permute.xlu1 %1888 }
 0xd55   : > { %3010 = vmatmul.mubr.msk.bf16.vlgmr.msra.gmra.mrb[28].mxu0 %vm939_vm10, %v3622_v44 }
 0xd56   : > { %3015 = vmatprep.mubr.msk.bf16.mxu0 %vm3220_vm2, %v3218_v1 }
 0xd58   : > { %v2001_v4 = vpop.permute.xlu1 %2000 }
 0xd59   : > { %v2006_v5 = vsel %vm939_vm10, %v2001_v4, 0 }
 0xd5c   : > { %v1999_v7 = vpop.permute.xlu1 %1998 }
 0xd60   : > { %v2109_v9 = vpop.permute.xlu1 %2108 }
 0xe28   : > { %v1822_v49 = vpop.f32.mrb[28].mxu0 }
 0xe29   : > { %v3011_v50 = vpop.f32.mrb[29].mxu0  ;;  %v1828_v51 = vsel %vm939_vm10, %v1822_v49, -inf }
 0xe2a   : > { %1829 = vmax.xlane.f32.xlu0 %v1828_v51  ;;  %v1825_v48 = vpop.f32.mrb[30].mxu0 }
 0xe2b   : > { %v3012_v52 = vpop.f32.mrb[31].mxu0 }
 0xeb7   : > { %v1830_v53 = vpop.xlane.xlu0 %1829 }
 0xeb8   : > { %v1831_v54 = vsub.f32 %v1822_v49, %v1830_v53 }
 0xeba   : > { %v1832_v55 = vmul.f32 1.442695, %v1831_v54 }
 0xebc   : > { %3179 = vpow2.f32 %v1832_v55 }
 0xec6   : > { %v3180_v56 = vpop.eup %3179 }
 0xec7   : > { %v1834_v57 = vsel %vm939_vm10, %v3180_v56, 0.0 }
 0xec8   : > { %1835 = vadd.xlane.f32.xlu0 %v1834_v57 }
 0xede   : > { %1840 = vrot.lane.b32.xlu0 %v3622_v44, %s3845_s0  ;;  %s2596_s0 = sld [smem:[#allocation2]] }
 0xee2   : > { %2110 = vrot.lane.b32.xlu0 %v3622_v44, %s3846_s30 }
 0xf55   : > { %v1836_v58 = vpop.xlane.xlu0 %1835 }
 0xf56   : > { %3181 = vrcp.f32 %v1836_v58 }
 0xf59   : > { %v1841_v59 = vpop.permute.xlu0 %1840 }
 0xf5a   : > { %v1846_v60 = vsel %vm1003_vm11, %v1841_v59, 0 }
 0xf5b   : > { %3014 = vmatpush3.bf16.msra.mxu0 %v1846_v60 }
 0xf5c   : > { %3019 = vmatprep.subr.bf16.mxu0 %v3218_v1 }
 0xf5d   : > { %v2111_v6 = vpop.permute.xlu0 %2110 }
 0xf5e   : > { %v2116_v8 = vsel %vm939_vm10, %v2111_v6, 0  ;;  %v3146_v6 = vld [vmem:[%s3803_s7 + $0x18] sm:$0xff]  }
 0xf60   : > { %v3182_v62 = vpop.eup %3181 }
 0xf61   : > { %v1838_v63 = vmul.f32 %v3182_v62, %v3180_v56 }
 0xf63   : > { %v1839_v0 = vpack.c.bf16 %v1838_v63, %v1838_v63 }
 0xf65   : > { %3016 = vmatmul.mubr.msk.bf16.vlgmr.msra.gmra.mrb[32].mxu0 %vm939_vm10, %v1839_v0  ;;  %v3145_v0 = vld [vmem:[%s3803_s7 + $0x10] sm:$0xff]  }
 0xf66   : > { %3020 = vmatpush3.bf16.xpose.msra.mxu0 %v1896_v3  ;;  %3021 = vmatprep.mubr.msk.bf16.mxu0 %vm3220_vm2, %v3218_v1 }
 0xf67   : > { %3031 = vmatprep.subr.bf16.mxu0 %v3218_v1 }
 0xf6d   : > { %3022 = vmatmul.mubr.msk.bf16.vlgmr.msra.gmra.mrb[36].mxu0 %vm939_vm10, %v1889_v2 }
 0xf6e   : > { %3032 = vmatpush3.bf16.xpose.msra.mxu0 %v2006_v5  ;;  %3033 = vmatprep.mubr.msk.bf16.mxu0 %vm3220_vm2, %v3218_v1 }
 0xf6f   : > { %3043 = vmatprep.subr.bf16.mxu0 %v3218_v1 }
 0xf75   : > { %3034 = vmatmul.mubr.msk.bf16.vlgmr.msra.gmra.mrb[40].mxu0 %vm939_vm10, %v1999_v7 }
 0xf76   : > { %3044 = vmatpush3.bf16.xpose.msra.mxu0 %v2116_v8  ;;  %3045 = vmatprep.mubr.msk.bf16.mxu0 %vm3220_vm2, %v3218_v1 }
 0xf77   : > { %3055 = vmatprep.subr.bf16.mxu0 %v3218_v1 }
 0xf7d   : > { %3046 = vmatmul.mubr.msk.bf16.vlgmr.msra.gmra.mrb[44].mxu0 %vm939_vm10, %v2109_v9 }
 0xf7e   : > { %3059 = vmatprep.mubr.msk.bf16.mxu0 %vm3220_vm2, %v3218_v1  ;;  %3056 = vmatpush3.bf16.msra.mxu0 %v3145_v0 }
 0xf7f   : > { %3057 = vmatprep.subr.bf16.mxu0 %v3218_v1 }
 0xf82   : > { %3058 = vmatpush3.bf16.msra.mxu0 %v3146_v6 }
 0xf83   : > { %3071 = vmatprep.subr.bf16.mxu0 %v3218_v1 }
0x1038   : > { %v3668_v10 = vpop.f32.mrb[32].mxu0 }
0x1039   : > { %v3017_v11 = vpop.f32.mrb[33].mxu0 }
0x103a   : > { %v1885_v12 = vpop.f32.mrb[34].mxu0 }
0x103b   : > { %v3018_v13 = vpop.f32.mrb[35].mxu0 }
0x1040   : > { %v1932_v14 = vpop.f32.mrb[36].mxu0 }
0x1041   : > { %v3023_v15 = vpop.f32.mrb[37].mxu0  ;;  %v1938_v16 = vsel %vm939_vm10, %v1932_v14, -inf }
0x1042   : > { %1939 = vmax.xlane.f32.xlu0 %v1938_v16  ;;  %v1935_v17 = vpop.f32.mrb[38].mxu0 }
0x1043   : > { %v3024_v18 = vpop.f32.mrb[39].mxu0 }
0x1048   : > { %v2042_v19 = vpop.f32.mrb[40].mxu0 }
0x1049   : > { %v3035_v20 = vpop.f32.mrb[41].mxu0  ;;  %v2048_v21 = vsel %vm939_vm10, %v2042_v19, -inf }
0x104a   : > { %2049 = vmax.xlane.f32.xlu1 %v2048_v21  ;;  %v2045_v22 = vpop.f32.mrb[42].mxu0 }
0x104b   : > { %v3036_v23 = vpop.f32.mrb[43].mxu0 }
0x104c   : > { %v2751_v23 = vld [vmem:[%s3804_s8 + $0x1] ss:$0 sm:$0xff] }
0x1050   : > { %v2152_v24 = vpop.f32.mrb[44].mxu0 }
0x1051   : > { %v3047_v25 = vpop.f32.mrb[45].mxu0  ;;  %v2158_v26 = vsel %vm939_vm10, %v2152_v24, -inf }
0x1052   : > { %2159 = vmax.xlane.f32.xlu0 %v2158_v26  ;;  %v2155_v27 = vpop.f32.mrb[46].mxu0 }
0x1053   : > { %v3048_v28 = vpop.f32.mrb[47].mxu0 }
0x105b   : > { %1950 = vrot.lane.b32.xlu1 %v3622_v44, %s3847_s5 }
0x10cf   : > { %v1940_v29 = vpop.xlane.xlu0 %1939 }
0x10d0   : > { %v1941_v30 = vsub.f32 %v1932_v14, %v1940_v29 }
0x10d2   : > { %v1942_v31 = vmul.f32 1.442695, %v1941_v30 }
0x10d4   : > { %3183 = vpow2.f32 %v1942_v31 }
0x10d7   : > { %v2050_v32 = vpop.xlane.xlu1 %2049 }
0x10d8   : > { %v2051_v33 = vsub.f32 %v2042_v19, %v2050_v32 }
0x10da   : > { %v2052_v34 = vmul.f32 1.442695, %v2051_v33 }
0x10db   : > { %v1951_v35 = vpop.permute.xlu1 %1950 }
0x10dc   : > { %3185 = vpow2.f32 %v2052_v34  ;;  %v1956_v37 = vsel %vm1003_vm11, %v1951_v35, 0  ;;  %v3147_v35 = vld [vmem:[%s3807_s11 + $0x10] sm:$0xff]  }
0x10dd   : > { %3026 = vmatpush3.bf16.msra.mxu1 %v1956_v37  ;;  %v3148_v37 = vld [vmem:[%s3807_s11 + $0x18] sm:$0xff]  }
0x10de   : > { %v3184_v38 = vpop.eup %3183  ;;  %3037 = vmatprep.subr.bf16.mxu1 %v3218_v1 }
0x10df   : > { %v2160_v39 = vpop.xlane.xlu0 %2159  ;;  %v1944_v41 = vsel %vm939_vm10, %v3184_v38, 0.0 }
0x10e0   : > { %v2161_v42 = vsub.f32 %v2152_v24, %v2160_v39  ;;  %1945 = vadd.xlane.f32.xlu0 %v1944_v41 }
0x10e2   : > { %v2162_v43 = vmul.f32 1.442695, %v2161_v42  ;;  %v2757_v42 = vld [vmem:[%s3805_s9 + $0x1] ss:$0 sm:$0xff] }
0x10e4   : > { %3187 = vpow2.f32 %v2162_v43 }
0x10e6   : > { %v3186_v45 = vpop.eup %3185 }
0x10e7   : > { %v2054_v46 = vsel %vm939_vm10, %v3186_v45, 0.0 }
0x10e8   : > { %2055 = vadd.xlane.f32.xlu1 %v2054_v46 }
0x10ee   : > { %v3188_v47 = vpop.eup %3187 }
0x10ef   : > { %v2164_v49 = vsel %vm939_vm10, %v3188_v47, 0.0 }
0x10f0   : > { %2165 = vadd.xlane.f32.xlu0 %v2164_v49 }
0x10f9   : > { %2170 = vrot.lane.b32.xlu1 %v3622_v44, %s3848_s23  ;;  %s2607_s23 = sld [smem:[#allocation3]] }
0x1106   : > { %2060 = vrot.lane.b32.xlu0 %v3622_v44, %s3849_s1 }
0x116d   : > { %v1946_v50 = vpop.xlane.xlu0 %1945 }
0x116e   : > { %3189 = vrcp.f32 %v1946_v50  ;;  %v3149_v50 = vld [vmem:[%s3809_s13 + $0x40] sm:$0xff]  }
0x1175   : > { %v2056_v51 = vpop.xlane.xlu1 %2055 }
0x1176   : > { %3191 = vrcp.f32 %v2056_v51  ;;  %v3150_v51 = vld [vmem:[%s3809_s13 + $0x48] sm:$0xff]  }
0x1178   : > { %v3190_v48 = vpop.eup %3189 }
0x1179   : > { %v1948_v52 = vmul.f32 %v3190_v48, %v3184_v38  ;;  %v2171_v44 = vpop.permute.xlu1 %2170  ;;  %v3151_v48 = vld [vmem:[%s3809_s13 + $0x50] sm:$0xff]  }
0x117a   : > { %v2176_v60 = vsel %vm1003_vm11, %v2171_v44, 0 }
0x117b   : > { %v1949_v53 = vpack.c.bf16 %v1948_v52, %v1948_v52  ;;  %v3152_v52 = vld [vmem:[%s3809_s13 + $0x58] sm:$0xff]  }
0x117d   : > { %3028 = vmatmul.mubr.msk.bf16.vlgmr.msra.gmra.mrb[32].mxu1 %vm939_vm10, %v1949_v53  ;;  %v2166_v54 = vpop.xlane.xlu0 %2165  ;;  %v3153_v53 = vld [vmem:[%s3809_s13 + $0x60] sm:$0xff]  }
0x117e   : > { %3193 = vrcp.f32 %v2166_v54  ;;  %3039 = vmatprep.mubr.msk.bf16.mxu1 %vm3220_vm2, %v3218_v1  ;;  %v3154_v54 = vld [vmem:[%s3809_s13 + $0x68] sm:$0xff]  }
0x1180   : > { %v3192_v55 = vpop.eup %3191 }
0x1181   : > { %v2058_v56 = vmul.f32 %v3192_v55, %v3186_v45  ;;  %v2061_v57 = vpop.permute.xlu0 %2060  ;;  %v2758_v45 = vld [vmem:[%s3806_s10 + $0x1] ss:$0 sm:$0xff]  ;;  %v3155_v55 = vld [vmem:[%s3809_s13 + $0x70] sm:$0xff]  }
0x1182   : > { %v2066_v58 = vsel %vm1003_vm11, %v2061_v57, 0  ;;  %v2764_v57 = vld [vmem:[%s3808_s12 + $0x1] ss:$0 sm:$0xff] }
0x1183   : > { %3038 = vmatpush3.bf16.msra.mxu1 %v2066_v58  ;;  %v2059_v59 = vpack.c.bf16 %v2058_v56, %v2058_v56  ;;  %v3156_v56 = vld [vmem:[%s3809_s13 + $0x78] sm:$0xff]  }
0x1184   : > { %3049 = vmatprep.subr.bf16.mxu1 %v3218_v1 }
0x1186   : > { %3040 = vmatmul.mubr.msk.bf16.vlgmr.msra.gmra.mrb[36].mxu1 %vm939_vm10, %v2059_v59 }
0x1187   : > { %3050 = vmatpush3.bf16.msra.mxu1 %v2176_v60  ;;  %3051 = vmatprep.mubr.msk.bf16.mxu1 %vm3220_vm2, %v3218_v1 }
0x1188   : > { %v3194_v61 = vpop.eup %3193  ;;  %3063 = vmatprep.subr.bf16.mxu1 %v3218_v1 }
0x1189   : > { %v2168_v62 = vmul.f32 %v3194_v61, %v3188_v47 }
0x118b   : > { %v2169_v63 = vpack.c.bf16 %v2168_v62, %v2168_v62 }
0x118e   : > { %3052 = vmatmul.mubr.msk.bf16.vlgmr.msra.gmra.mrb[40].mxu1 %vm939_vm10, %v2169_v63 }
0x118f   : > { %3067 = vmatprep.mubr.msk.bf16.mxu1 %vm3220_vm2, %v3218_v1  ;;  %3064 = vmatpush3.bf16.msra.mxu1 %v3147_v35 }
0x1190   : > { %3065 = vmatprep.subr.bf16.mxu1 %v3218_v1 }
0x1193   : > { %3066 = vmatpush3.bf16.msra.mxu1 %v3148_v37 }
0x1250   : > { %v1992_v2 = vpop.f32.mrb[32].mxu1 }
0x1251   : > { %2219 = vrot.lane.b32.xlu1 %v1992_v2, %s3850_s2  ;;  %v3029_v3 = vpop.f32.mrb[33].mxu1 }
0x1252   : > { %v1995_v4 = vpop.f32.mrb[34].mxu1 }
0x1253   : > { %v3030_v5 = vpop.f32.mrb[35].mxu1 }
0x1259   : > { %v2102_v7 = vpop.f32.mrb[36].mxu1 }
0x125a   : > { %2223 = vrot.lane.b32.xlu0 %v2102_v7, %s3851_s20  ;;  %v3041_v8 = vpop.f32.mrb[37].mxu1 }
0x125b   : > { %v2105_v9 = vpop.f32.mrb[38].mxu1  ;;  %v2785_v8 = vld [vmem:[%s3810_s14 + $0x1] ss:$0 sm:$0xff] }
0x125c   : > { %v3042_v11 = vpop.f32.mrb[39].mxu1 }
0x1261   : > { %v2212_v12 = vpop.f32.mrb[40].mxu1 }
0x1262   : > { %2227 = vrot.lane.b32.xlu1 %v2212_v12, %s3852_s24  ;;  %v3053_v13 = vpop.f32.mrb[41].mxu1 }
0x1263   : > { %v2215_v14 = vpop.f32.mrb[42].mxu1 }
0x1264   : > { %v3054_v15 = vpop.f32.mrb[43].mxu1 }
0x12c3   : > { %v2220_v16 = vpop.permute.xlu1 %2219 }
0x12c4   : > { %v2230_v18 = vsel %vm939_vm10, %v3668_v10, %v2220_v16 }
0x12cc   : > { %v2224_v17 = vpop.permute.xlu0 %2223 }
0x12cd   : > { %v2231_v19 = vsel %vm1390_vm12, %v2230_v18, %v2224_v17 }
0x12d4   : > { %v2228_v20 = vpop.permute.xlu1 %2227 }
0x12d5   : > { %v2232_v21 = vsel %vm861_vm7, %v2231_v19, %v2228_v20 }
0x12d6   : > { %v2233_v22 = vpack.c.bf16 %v2232_v21, %v2232_v21 }
0x12d8   : > { %3060 = vmatmul.mubr.msk.bf16.vlgmr.msra.gmra.mrb[48].mxu0 %vm891_vm9, %v2233_v22 }
0x12d9   : > { %3087 = vmatprep.mubr.msk.bf16.mxu0 %vm3220_vm2, %v3218_v1  ;;  %3072 = vmatpush3.bf16.msra.mxu0 %v3149_v50 }
0x12da   : > { %3073 = vmatprep.subr.bf16.mxu0 %v3218_v1 }
0x12dd   : > { %3074 = vmatpush3.bf16.msra.mxu0 %v3150_v51 }
0x12de   : > { %3075 = vmatprep.subr.bf16.mxu0 %v3218_v1 }
0x12e1   : > { %3076 = vmatpush3.bf16.msra.mxu0 %v3151_v48 }
0x12e2   : > { %3077 = vmatprep.subr.bf16.mxu0 %v3218_v1 }
0x12e5   : > { %3078 = vmatpush3.bf16.msra.mxu0 %v3152_v52 }
0x12e6   : > { %3079 = vmatprep.subr.bf16.mxu0 %v3218_v1 }
0x12e9   : > { %3080 = vmatpush3.bf16.msra.mxu0 %v3153_v53 }
0x12ea   : > { %3081 = vmatprep.subr.bf16.mxu0 %v3218_v1 }
0x12ed   : > { %3082 = vmatpush3.bf16.msra.mxu0 %v3154_v54 }
0x12ee   : > { %3083 = vmatprep.subr.bf16.mxu0 %v3218_v1 }
0x12f1   : > { %3084 = vmatpush3.bf16.msra.mxu0 %v3155_v55 }
0x12f2   : > { %3085 = vmatprep.subr.bf16.mxu0 %v3218_v1 }
0x12f5   : > { %3086 = vmatpush3.bf16.msra.mxu0 %v3156_v56 }
0x13ab   : > { %v2296_v24 = vpop.f32.mrb[48].mxu0 }
0x13ac   : > { %v2297_v25 = vadd.f32 %v2751_v23, %v2296_v24  ;;  %v3061_v26 = vpop.f32.mrb[49].mxu0 }
0x13ad   : > { %v2299_v27 = vpop.f32.mrb[50].mxu0  ;;  %v2796_v26 = vld [vmem:[%s3811_s15 + $0x1] ss:$0 sm:$0xff] }
0x13ae   : > { %v3062_v10 = vpop.f32.mrb[51].mxu0  ;;  %v2302_v28 = vadd.f32 %v2297_v25, %v3612_v36 }
0x13af   : > { %v2797_v10 = vld [vmem:[%s3812_s16 + $0x1] ss:$0 sm:$0xff] }
0x13b0   : > { %v2307_v29 = vsel %vm891_vm9, %v2302_v28, 0.0 }
0x13b1   : > { %2308 = vadd.xlane.f32.xlu0 %v2307_v29  ;;  %v2558_v29 = vmul.f32 0.2, %v3430_v40 }
0x143e   : > { %v2309_v30 = vpop.xlane.xlu0 %2308 }
0x143f   : > { %v2310_v31 = vmul.f32 0.03125, %v2309_v30 }
0x1441   : > { %v2311_v32 = vsub.f32 %v2302_v28, %v2310_v31  ;;  %v2798_v31 = vld [vmem:[%s3813_s17] ss:$0 sm:$0xff] }
0x1443   : > { %v2312_v33 = vmul.f32 %v2311_v32, %v2311_v32 }
0x1445   : > { %v2313_v34 = vsel %vm891_vm9, %v2312_v33, 0.0 }
0x1446   : > { %2314 = vadd.xlane.f32.xlu1 %v2313_v34 }
0x14d3   : > { %v2315_v36 = vpop.xlane.xlu1 %2314 }
0x14d4   : > { %v2316_v38 = vmul.f32 0.03125, %v2315_v36 }
0x14d6   : > { %v2317_v39 = vadd.f32 1e-12, %v2316_v38 }
0x14d8   : > { %3195 = vrsqrt.f32 %v2317_v39 }
0x14e2   : > { %v3196_v41 = vpop.eup %3195 }
0x14e3   : > { %v2319_v43 = vmul.f32 %v3196_v41, %v2311_v32 }
0x14e5   : > { %v2326_v46 = vmul.f32 %v2757_v42, %v2319_v43 }
0x14e7   : > { %v2333_v47 = vadd.f32 %v2758_v45, %v2326_v46 }
0x14e9   : > { %v2334_v49 = vpack.c.bf16 %v2333_v47, %v2333_v47 }
0x14eb   : > { %3068 = vmatmul.mubr.msk.bf16.vlgmr.msra.gmra.mrb[44].mxu1 %vm891_vm9, %v2334_v49 }
0x15be   : > { %v2397_v58 = vpop.f32.mrb[44].mxu1 }
0x15bf   : > { %v2398_v44 = vadd.f32 %v2764_v57, %v2397_v58  ;;  %v3069_v59 = vpop.f32.mrb[45].mxu1 }
0x15c0   : > { %v2400_v60 = vpop.f32.mrb[46].mxu1 }
0x15c1   : > { %v2403_v61 = vmul.f32 %v2398_v44, %v2398_v44  ;;  %v3070_v62 = vpop.f32.mrb[47].mxu1  ;;  %v2598_v60 = vstv %s2596_s0 }
0x15c3   : > { %v2404_v63 = vmul.f32 %v2403_v61, %v2398_v44 }
0x15c5   : > { %v2405_v0 = vmul.f32 0.044715, %v2404_v63  ;;  %v2601_v63 = vld [vmem:[%s3814_s18] sm:$0x1] }
0x15c7   : > { %v2406_v2 = vadd.f32 %v2405_v0, %v2398_v44 }
0x15c9   : > { %v2407_v3 = vmul.f32 0.7978846, %v2406_v2 }
0x15cb   : > { %3197 = vtanh.f32 %v2407_v3 }
0x15d5   : > { %v3198_v4 = vpop.eup %3197 }
0x15d6   : > { %v2409_v5 = vadd.f32 1.0, %v3198_v4  ;;  %v2608_v4 = vstv %s2607_s23 }
0x15d8   : > { %v2410_v6 = vmul.f32 0.5, %v2409_v5 }
0x15da   : > { %v2411_v1 = vmul.f32 %v2410_v6, %v2398_v44 }
0x15dc   : > { %v2412_v7 = vpack.c.bf16 %v2411_v1, %v2411_v1 }
0x15de   : > { %3088 = vmatmul.mubr.bf16.vlgmr.msra.gmra.mrb[52].mxu0 %v2412_v7 }
0x16b1   : > { %v2520_v9 = vpop.f32.mrb[52].mxu0 }
0x16b2   : > { %v2521_v11 = vadd.f32 %v2785_v8, %v2520_v9  ;;  %v3089_v12 = vpop.f32.mrb[53].mxu0 }
0x16b3   : > { %v2523_v13 = vpop.f32.mrb[54].mxu0 }
0x16b4   : > { %v3090_v14 = vpop.f32.mrb[55].mxu0  ;;  %v2526_v15 = vadd.f32 %v2521_v11, %v2333_v47 }
0x16b6   : > { %v2531_v16 = vsel %vm891_vm9, %v2526_v15, 0.0 }
0x16b7   : > { %2532 = vadd.xlane.f32.xlu0 %v2531_v16 }
0x1744   : > { %v2533_v17 = vpop.xlane.xlu0 %2532 }
0x1745   : > { %v2534_v18 = vmul.f32 0.03125, %v2533_v17 }
0x1747   : > { %v2535_v19 = vsub.f32 %v2526_v15, %v2534_v18 }
0x1749   : > { %v2536_v20 = vmul.f32 %v2535_v19, %v2535_v19 }
0x174b   : > { %v2537_v21 = vsel %vm891_vm9, %v2536_v20, 0.0 }
0x174c   : > { %2538 = vadd.xlane.f32.xlu0 %v2537_v21 }
0x17d9   : > { %v2539_v22 = vpop.xlane.xlu0 %2538 }
0x17da   : > { %v2540_v23 = vmul.f32 0.03125, %v2539_v22 }
0x17dc   : > { %v2541_v24 = vadd.f32 1e-12, %v2540_v23 }
0x17de   : > { %3199 = vrsqrt.f32 %v2541_v24 }
0x17e8   : > { %v3200_v25 = vpop.eup %3199 }
0x17e9   : > { %v2543_v27 = vmul.f32 %v3200_v25, %v2535_v19 }
0x17eb   : > { %v2550_v28 = vmul.f32 %v2796_v26, %v2543_v27 }
0x17ed   : > { %v2557_v30 = vadd.f32 %v2797_v10, %v2550_v28 }
0x17ef   : > { %v2559_v32 = vadd.f32 %v2558_v29, %v2557_v30 }
0x17f1   : > { %v2567_v33 = vmul.f32 %v2798_v31, %v2559_v32 }
0x17f3   : > { %v2568_v34 = vsel %vm891_vm9, %v2567_v33, 0.0 }
0x17f4   : > { %2569 = vadd.xlane.f32.xlu1 %v2568_v34 }
0x1881   : > { %v2570_v35 = vpop.xlane.xlu1 %2569 }
0x1882   : > { %v2571_v37 = vrot.slane %v2570_v35, 4 }
0x1884   : > { %v2572_v36 = vmax.f32 %v2570_v35, %v2571_v37 }
0x1886   : > { %v2573_v38 = vrot.slane %v2572_v36, 2 }
0x1888   : > { %v2574_v39 = vmax.f32 %v2572_v36, %v2573_v38 }
0x188a   : > { %v2575_v41 = vrot.slane %v2574_v39, 1 }
0x188c   : > { %v2576_v42 = vmax.f32 %v2574_v39, %v2575_v41 }
0x188e   : > { %v2577_v43 = vsub.f32 %v2570_v35, %v2576_v42 }
0x1890   : > { %v2578_v45 = vmul.f32 1.442695, %v2577_v43 }
0x1892   : > { %3201 = vpow2.f32 %v2578_v45 }
0x189c   : > { %v3202_v40 = vpop.eup %3201 }
0x189d   : > { %v2580_v46 = vrot.slane %v3202_v40, 4 }
0x189f   : > { %v2581_v47 = vadd.f32 %v3202_v40, %v2580_v46 }
0x18a1   : > { %v2582_v49 = vrot.slane %v2581_v47, 2 }
0x18a3   : > { %v2583_v50 = vadd.f32 %v2582_v49, %v2581_v47 }
0x18a5   : > { %v2584_v51 = vrot.slane %v2583_v50, 1 }
0x18a7   : > { %v2585_v48 = vadd.f32 %v2584_v51, %v2583_v50 }
0x18a9   : > { %3203 = vrcp.f32 %v2585_v48 }
0x18b3   : > { %v3204_v52 = vpop.eup %3203 }
0x18b4   : > { %v2587_v53 = vmul.f32 %v3204_v52, %v3202_v40 }
0x18b6   : > { %v2588_v54 = vmul.f32 %v2587_v53, %v2559_v32 }
0x18b8   : > { %v2589_v55 = vsel %vm891_vm9, %v2588_v54, 0.0 }
0x18b9   : > { %v2590_v56 = vrot.slane %v2589_v55, 4 }
0x18bb   : > { %v2591_v57 = vadd.f32 %v2590_v56, %v2589_v55 }
0x18bd   : > { %v2592_v58 = vrot.slane %v2591_v57, 2 }
0x18bf   : > { %v2593_v44 = vadd.f32 %v2592_v58, %v2591_v57 }
0x18c1   : > { %v2594_v59 = vrot.slane %v2593_v44, 1 }
0x18c3   : > { %v2595_v61 = vadd.f32 %v2594_v59, %v2593_v44 }
0x18c5   : > { %vm2597_vm13 = vcmp.ge.f32.partialorder %v2595_v61, 0.0  ;;  %v2599_v62 = vmul.f32 %v2598_v60, %v2595_v61 }
0x18c7   : > { %v2600_v0 = vsel %vm2597_vm13, %v2595_v61, %v2599_v62 }
0x18c8   : > { %v2602_v2 = vmul.f32 %v2601_v63, %v2600_v0 }
0x18ca   : > { %v2604_v3 = vsel %vm2603_vm14, %v2602_v2, 0.0 }
0x18cb   : > { %2605 = vadd.xlane.f32.xlu0 %v2604_v3 }
0x1958   : > { %v2606_v5 = vpop.xlane.xlu0 %2605 }
0x1959   : > { %v2609_v6 = vadd.f32 %v2608_v4, %v2606_v5 }
0x195b   : > { %v2799_v1 = vmul.f32 -1.442695, %v2609_v6 }
0x195d   : > { %3205 = vpow2.f32 %v2799_v1 }
0x1967   : > { %v3206_v7 = vpop.eup %3205 }
0x1968   : > { %v2613_v8 = vadd.f32 1.0, %v3206_v7 }
0x196a   : > { %3207 = vrcp.f32 %v2613_v8 }
0x1974   : > { %v3208_v9 = vpop.eup %3207 }
0x1975   : > { %2617 = vst.msk [vmem:[%s668_s19] sm:$0x1] %vm2616_vm15, %v3208_v9 }
0x1976 PF: > { %s33_s3 = sadd.s32 1, %s3215_s3  }
0x1977   : > { %p30_p4 = scmp.ge.s32.totalorder %s33_s3, 4  }
0x1979   :  { %32 = sbr.rel (!%p30_p4) target bundleno = 9 (0x9), region = 149 }

</bundles_post_ra>
